<compile_context>
chip_gen: v7x
topology: tpu7x:2x2x1
jax: 0.10.0
libtpu: 0.0.40
codegen_flags: <defaults>
</compile_context>

<pallas_src>
import functools

import jax
import jax.numpy as jnp
from jax.experimental import pallas as pl
from jax.experimental.pallas import tpu as pltpu


def _round_up(n: int, m: int) -> int:
    return (n + m - 1) // m * m


def _choose_tb(B: int, tb_max: int = 4096) -> int:
    """Batch tile: whole batch in one step if it fits under tb_max, otherwise
    >=4 grid steps (>=2 per v7x TensorCore) of size <= tb_max, multiple of 8."""
    b8 = _round_up(B, 8)
    if b8 <= tb_max:
        return b8
    n_steps = max(4, -(-b8 // tb_max))
    return _round_up(-(-b8 // n_steps), 8)


def _mlp_kernel(x_ref, w1_ref, vecs_ref, w2_ref, o_ref, *, hidden_true: int):
    h_pad = w1_ref.shape[1]
    n_cls = o_ref.shape[1]

    # ---- layer1: Linear (bf16 operands on the MXU, f32 accumulation) ----
    x = x_ref[...].astype(jnp.bfloat16)
    h = jnp.dot(x, w1_ref[...], preferred_element_type=jnp.float32)  # (TB, h_pad) f32

    vecs = vecs_ref[...]                      # (8, 128) f32, single DMA'd tile
    b1 = vecs[0:1, :h_pad]
    gamma = vecs[1:2, :h_pad]
    beta = vecs[2:3, :h_pad]
    b2 = vecs[3:4, :n_cls]

    h = h + b1                                # padded lanes stay exactly 0

    # ---- layer1: LayerNorm over the TRUE hidden width (eps=1e-5) ----
    # Padded lanes of h are exactly zero, so full-width sums equal true-width
    # sums; divide by hidden_true. One-pass variance, clamped at 0.
    inv_h = 1.0 / float(hidden_true)
    mean = jnp.sum(h, axis=-1, keepdims=True) * inv_h
    mean_sq = jnp.sum(h * h, axis=-1, keepdims=True) * inv_h
    var = jnp.maximum(mean_sq - mean * mean, 0.0)
    hn = (h - mean) * jax.lax.rsqrt(var + 1e-5)
    hn = hn * gamma + beta                    # padded gamma/beta = 0 -> lanes zeroed

    # ---- layer1: ReLU (+ Dropout == identity at eval) ----
    hn = jnp.maximum(hn, 0.0)

    # ---- layer2: Linear (bf16 operands, f32 accumulation), un-padded classes ----
    out = jnp.dot(hn.astype(jnp.bfloat16), w2_ref[...],
                  preferred_element_type=jnp.float32)       # (TB, n_cls)
    out = out + b2
    o_ref[...] = out.astype(o_ref.dtype)


def pack_params(w1, b1, gamma, beta, w2, b2):
    """Zero-pad the hidden dim to a multiple of 128 (lane-dense intermediate),
    keep the class dim un-padded, cast weights to bf16 for the MXU and pack
    the four per-feature vectors into one (8, 128) f32 tile."""
    d_in, hidden = w1.shape
    _, num_classes = w2.shape
    h_pad = _round_up(hidden, 128)
    vec_w = max(h_pad, _round_up(num_classes, 128))

    w1p = jnp.zeros((d_in, h_pad), jnp.bfloat16).at[:, :hidden].set(
        w1.astype(jnp.bfloat16))
    w2p = jnp.zeros((h_pad, num_classes), jnp.bfloat16).at[:hidden, :].set(
        w2.astype(jnp.bfloat16))

    vecs = jnp.zeros((8, vec_w), jnp.float32)
    vecs = vecs.at[0, :hidden].set(b1)
    vecs = vecs.at[1, :hidden].set(gamma)
    vecs = vecs.at[2, :hidden].set(beta)
    vecs = vecs.at[3, :num_classes].set(b2)
    return w1p, vecs, w2p


def classification_model_forward(x, w1p, vecs, w2p, *, hidden_true, num_classes,
                                 tb_max=4096):
    B, d_in = x.shape
    h_pad = w1p.shape[1]

    tb = _choose_tb(B, tb_max)
    b_pad = _round_up(B, tb)
    if b_pad != B:
        x = jnp.pad(x, ((0, b_pad - B), (0, 0)))
    grid = (b_pad // tb,)

    kernel = functools.partial(_mlp_kernel, hidden_true=hidden_true)

    flops = 2 * b_pad * (d_in * h_pad + h_pad * num_classes)
    bytes_accessed = (b_pad * d_in * 4 +               # x read (f32)
                      b_pad * num_classes * 4 +        # logits write (f32, un-padded)
                      w1p.size * 2 + w2p.size * 2 +    # bf16 weights
                      vecs.size * 4)

    out = pl.pallas_call(
        kernel,
        out_shape=jax.ShapeDtypeStruct((b_pad, num_classes), jnp.float32),
        grid=grid,
        in_specs=[
            pl.BlockSpec((tb, d_in), lambda i: (i, 0)),       # activations: tiled
            pl.BlockSpec(w1p.shape, lambda i: (0, 0)),        # weights: resident
            pl.BlockSpec(vecs.shape, lambda i: (0, 0)),       # packed b1/gamma/beta/b2
            pl.BlockSpec(w2p.shape, lambda i: (0, 0)),        # weights: resident
        ],
        out_specs=pl.BlockSpec((tb, num_classes), lambda i: (i, 0)),
        compiler_params=pltpu.CompilerParams(
            dimension_semantics=("parallel",)),                # megacore on v7x
        cost_estimate=pl.CostEstimate(flops=flops, transcendentals=b_pad,
                                      bytes_accessed=bytes_accessed),
    )(x, w1p, vecs, w2p)

    if b_pad != B:
        out = out[:B]          # batch-dim slice only; class dim is already exact
    return out


def init_params(key, input_size, hidden_size, num_classes):
    """Deterministic init mirroring the PyTorch module:
    kaiming_normal_(nonlinearity='relu') for Linear weights, zero biases,
    LayerNorm gamma=1, beta=0."""
    k1, k2 = jax.random.split(key, 2)
    w1 = jax.random.normal(k1, (input_size, hidden_size), jnp.float32) * jnp.sqrt(
        2.0 / input_size)
    b1 = jnp.zeros((hidden_size,), jnp.float32)
    gamma = jnp.ones((hidden_size,), jnp.float32)
    beta = jnp.zeros((hidden_size,), jnp.float32)
    w2 = jax.random.normal(k2, (hidden_size, num_classes), jnp.float32) * jnp.sqrt(
        2.0 / hidden_size)
    b2 = jnp.zeros((num_classes,), jnp.float32)
    return w1, b1, gamma, beta, w2, b2


def reference_forward_f32(x, w1, b1, gamma, beta, w2, b2):
    h = x @ w1 + b1
    mean = jnp.mean(h, axis=-1, keepdims=True)
    var = jnp.mean((h - mean) ** 2, axis=-1, keepdims=True)
    h = (h - mean) * jax.lax.rsqrt(var + 1e-5) * gamma + beta
    h = jnp.maximum(h, 0.0)
    return h @ w2 + b2


def reference_forward_bf16_mxu(x, w1, b1, gamma, beta, w2, b2):
    """Mirror of the kernel's numerics (bf16 MXU operands, f32 accum, f32 LN)."""
    h = jnp.dot(x.astype(jnp.bfloat16), w1.astype(jnp.bfloat16),
                preferred_element_type=jnp.float32) + b1
    mean = jnp.mean(h, axis=-1, keepdims=True)
    var = jnp.maximum(jnp.mean(h * h, axis=-1, keepdims=True) - mean * mean, 0.0)
    hn = (h - mean) * jax.lax.rsqrt(var + 1e-5) * gamma + beta
    hn = jnp.maximum(hn, 0.0)
    return jnp.dot(hn.astype(jnp.bfloat16), w2.astype(jnp.bfloat16),
                   preferred_element_type=jnp.float32) + b2


if __name__ == "__main__":
    batch = 512          # <= tb_max -> whole batch in one grid step
    input_size = 32
    hidden_size = 64
    num_classes = 16

    key = jax.random.PRNGKey(0)
    kx, kp = jax.random.split(key)
    x = jax.random.normal(kx, (batch, input_size), jnp.float32)
    params = init_params(kp, input_size, hidden_size, num_classes)
    w1p, vecs, w2p = pack_params(*params)

    out = classification_model_forward(
        x, w1p, vecs, w2p,
        hidden_true=hidden_size, num_classes=num_classes)
    out = jax.block_until_ready(out)
    assert out.shape == (batch, num_classes)

    ref_bf16 = reference_forward_bf16_mxu(x, *params)
    ref_f32 = reference_forward_f32(x, *params)
    assert jnp.allclose(out, ref_bf16, atol=2e-3, rtol=2e-3), \
        "mismatch vs bf16-matmul reference"
    assert jnp.allclose(out, ref_f32, atol=7e-2, rtol=7e-2), \
        "drift vs f32 reference beyond bf16 budget"

    # Also exercise the multi-step tiled path (batch not divisible by tile).
    B2 = 9000
    x2 = jax.random.normal(jax.random.PRNGKey(1), (B2, input_size), jnp.float32)
    out2 = jax.block_until_ready(classification_model_forward(
        x2, w1p, vecs, w2p, hidden_true=hidden_size, num_classes=num_classes,
        tb_max=2048))
    assert out2.shape == (B2, num_classes)
    assert jnp.allclose(out2, reference_forward_bf16_mxu(x2, *params),
                        atol=2e-3, rtol=2e-3), "tiled-path mismatch"

    print("KERNEL_OK")
</pallas_src>

<mosaic_0001>
module attributes {stable_mosaic.version = 11 : i64} {
  func.func @_mlp_kernel(%arg0: i32, %arg1: memref<512x32xf32, #tpu.memory_space<vmem>>, %arg2: memref<32x128xbf16, #tpu.memory_space<vmem>>, %arg3: memref<8x128xf32, #tpu.memory_space<vmem>>, %arg4: memref<128x16xbf16, #tpu.memory_space<vmem>>, %arg5: memref<512x16xf32, #tpu.memory_space<vmem>>) attributes {dimension_semantics = [#tpu.dimension_semantics<parallel>], iteration_bounds = array<i64: 1>, scalar_prefetch = 0 : i64, scratch_operands = 0 : i64, tpu.core_type = #tpu.core_type<tc>, window_params = [{transform_indices = @transform_0, window_bounds = array<i64: 512, 32>}, {pipeline_mode = #tpu.pipeline_mode<synchronous>, transform_indices = @transform_1, window_bounds = array<i64: 32, 128>}, {pipeline_mode = #tpu.pipeline_mode<synchronous>, transform_indices = @transform_2, window_bounds = array<i64: 8, 128>}, {pipeline_mode = #tpu.pipeline_mode<synchronous>, transform_indices = @transform_3, window_bounds = array<i64: 128, 16>}, {transform_indices = @transform_4, window_bounds = array<i64: 512, 16>}]} {
    %c0 = arith.constant 0 : index
    %c0_0 = arith.constant 0 : index
    %0 = vector.load %arg1[%c0, %c0_0] : memref<512x32xf32, #tpu.memory_space<vmem>>, vector<512x32xf32>
    %1 = arith.truncf %0 : vector<512x32xf32> to vector<512x32xbf16>
    %c0_1 = arith.constant 0 : index
    %c0_2 = arith.constant 0 : index
    %2 = vector.load %arg2[%c0_1, %c0_2] : memref<32x128xbf16, #tpu.memory_space<vmem>>, vector<32x128xbf16>
    %cst = arith.constant dense<0.000000e+00> : vector<512x128xf32>
    %3 = tpu.matmul %1, %2, %cst {dimension_numbers = #tpu.dot_dimension_numbers<[1], [0], [0], [1], [0, 0, 1, 1], [], []>} : vector<512x32xbf16>, vector<32x128xbf16>, vector<512x128xf32> -> vector<512x128xf32>
    %c0_3 = arith.constant 0 : index
    %c0_4 = arith.constant 0 : index
    %4 = vector.load %arg3[%c0_3, %c0_4] : memref<8x128xf32, #tpu.memory_space<vmem>>, vector<8x128xf32>
    %5 = vector.extract_strided_slice %4 {offsets = [0, 0], sizes = [1, 128], strides = [1, 1]} : vector<8x128xf32> to vector<1x128xf32>
    %6 = vector.extract_strided_slice %4 {offsets = [1, 0], sizes = [1, 128], strides = [1, 1]} : vector<8x128xf32> to vector<1x128xf32>
    %7 = vector.extract_strided_slice %4 {offsets = [2, 0], sizes = [1, 128], strides = [1, 1]} : vector<8x128xf32> to vector<1x128xf32>
    %8 = vector.extract_strided_slice %4 {offsets = [3, 0], sizes = [1, 16], strides = [1, 1]} : vector<8x128xf32> to vector<1x16xf32>
    %9 = vector.broadcast %5 : vector<1x128xf32> to vector<512x128xf32>
    %10 = arith.addf %3, %9 : vector<512x128xf32>
    %cst_5 = arith.constant dense<0.000000e+00> : vector<512xf32>
    %11 = vector.multi_reduction <add>, %10, %cst_5 [1] : vector<512x128xf32> to vector<512xf32>
    %12 = vector.shape_cast %11 : vector<512xf32> to vector<512x1xf32>
    %cst_6 = arith.constant 1.562500e-02 : f32
    %13 = vector.broadcast %cst_6 : f32 to vector<512x1xf32>
    %14 = arith.mulf %12, %13 : vector<512x1xf32>
    %15 = arith.mulf %10, %10 : vector<512x128xf32>
    %cst_7 = arith.constant dense<0.000000e+00> : vector<512xf32>
    %16 = vector.multi_reduction <add>, %15, %cst_7 [1] : vector<512x128xf32> to vector<512xf32>
    %17 = vector.shape_cast %16 : vector<512xf32> to vector<512x1xf32>
    %cst_8 = arith.constant 1.562500e-02 : f32
    %18 = vector.broadcast %cst_8 : f32 to vector<512x1xf32>
    %19 = arith.mulf %17, %18 : vector<512x1xf32>
    %20 = arith.mulf %14, %14 : vector<512x1xf32>
    %21 = arith.subf %19, %20 : vector<512x1xf32>
    %cst_9 = arith.constant 0.000000e+00 : f32
    %22 = vector.broadcast %cst_9 : f32 to vector<512x1xf32>
    %23 = arith.maximumf %21, %22 : vector<512x1xf32>
    %24 = vector.broadcast %14 : vector<512x1xf32> to vector<512x128xf32>
    %25 = arith.subf %10, %24 : vector<512x128xf32>
    %cst_10 = arith.constant 9.99999974E-6 : f32
    %26 = vector.broadcast %cst_10 : f32 to vector<512x1xf32>
    %27 = arith.addf %23, %26 : vector<512x1xf32>
    %28 = math.rsqrt %27 : vector<512x1xf32>
    %29 = vector.broadcast %28 : vector<512x1xf32> to vector<512x128xf32>
    %30 = arith.mulf %25, %29 : vector<512x128xf32>
    %31 = vector.broadcast %6 : vector<1x128xf32> to vector<512x128xf32>
    %32 = arith.mulf %30, %31 : vector<512x128xf32>
    %33 = vector.broadcast %7 : vector<1x128xf32> to vector<512x128xf32>
    %34 = arith.addf %32, %33 : vector<512x128xf32>
    %cst_11 = arith.constant 0.000000e+00 : f32
    %35 = vector.broadcast %cst_11 : f32 to vector<512x128xf32>
    %36 = arith.maximumf %34, %35 : vector<512x128xf32>
    %37 = arith.truncf %36 : vector<512x128xf32> to vector<512x128xbf16>
    %c0_12 = arith.constant 0 : index
    %c0_13 = arith.constant 0 : index
    %38 = vector.load %arg4[%c0_12, %c0_13] : memref<128x16xbf16, #tpu.memory_space<vmem>>, vector<128x16xbf16>
    %cst_14 = arith.constant dense<0.000000e+00> : vector<512x16xf32>
    %39 = tpu.matmul %37, %38, %cst_14 {dimension_numbers = #tpu.dot_dimension_numbers<[1], [0], [0], [1], [0, 0, 1, 1], [], []>} : vector<512x128xbf16>, vector<128x16xbf16>, vector<512x16xf32> -> vector<512x16xf32>
    %40 = vector.broadcast %8 : vector<1x16xf32> to vector<512x16xf32>
    %41 = arith.addf %39, %40 : vector<512x16xf32>
    %c0_15 = arith.constant 0 : index
    %c0_16 = arith.constant 0 : index
    %42 = vector.load %arg5[%c0_15, %c0_16] : memref<512x16xf32, #tpu.memory_space<vmem>>, vector<512x16xf32>
    tpu.vector_store %arg5[%c0_15, %c0_16], %41 {strides = array<i32>} : memref<512x16xf32, #tpu.memory_space<vmem>>, vector<512x16xf32>,
    return
  }
  func.func @transform_0(%arg0: i32) -> (i32, i32) {
    %c0_i32 = arith.constant 0 : i32
    %c0_i32_0 = arith.constant 0 : i32
    return %arg0, %c0_i32 : i32, i32
  }
  func.func @transform_1(%arg0: i32) -> (i32, i32) {
    %c0_i32 = arith.constant 0 : i32
    %c0_i32_0 = arith.constant 0 : i32
    %c0_i32_1 = arith.constant 0 : i32
    return %c0_i32, %c0_i32_0 : i32, i32
  }
  func.func @transform_2(%arg0: i32) -> (i32, i32) {
    %c0_i32 = arith.constant 0 : i32
    %c0_i32_0 = arith.constant 0 : i32
    %c0_i32_1 = arith.constant 0 : i32
    return %c0_i32, %c0_i32_0 : i32, i32
  }
  func.func @transform_3(%arg0: i32) -> (i32, i32) {
    %c0_i32 = arith.constant 0 : i32
    %c0_i32_0 = arith.constant 0 : i32
    %c0_i32_1 = arith.constant 0 : i32
    return %c0_i32, %c0_i32_0 : i32, i32
  }
  func.func @transform_4(%arg0: i32) -> (i32, i32) {
    %c0_i32 = arith.constant 0 : i32
    %c0_i32_0 = arith.constant 0 : i32
    return %arg0, %c0_i32 : i32, i32
  }
}

</mosaic_0001>

<bundles_post_ra>
// kernel: tpu_custom_call.1
= control target key start
LH: loop header
LB: loop body
LE: loop exit
PB: predicated region body
PF: predicated region fallthrough
CT: control target
= control target key end

     0   :  { %vm135_vm0 = vcmask 261120   ;;  %vm2006_vm1 = vcmask 130048   ;;  %s4167_s1 = inlined_call_operand.vmem [shape: bf16[32,128], index: 1, kind: input, shape index: {}]   ;;  %s4168_s0 = inlined_call_operand.vmem [shape: f32[512,32], index: 0, kind: input, shape index: {}]   ;;  %s4169_s2 = inlined_call_operand.vmem [shape: f32[8,128], index: 2, kind: input, shape index: {}]   ;;  %s4170_s3 = inlined_call_operand.vmem [shape: bf16[128,16], index: 3, kind: input, shape index: {}]   ;;  %s4171_s4 = inlined_call_operand.vmem [shape: f32[512,16], index: 4, kind: output, shape index: {}]  }
   0x1   :  { %v2355_v0 = vld [vmem:[%s4167_s1] sm:$0xff]   ;;  %v2356_v1 = vld [vmem:[%s4167_s1 + $0x8] sm:$0xff]   ;;  %v20_v5 = vld [vmem:[%s4168_s0 + $0x10] sm:$0xff] }
   0x2   :  { %2191 = vmatprep.subr.bf16.mxu0 %v2355_v0  ;;  %v18_v2 = vld [vmem:[%s4168_s0] sm:$0xff]  ;;  %v19_v3 = vld [vmem:[%s4168_s0 + $0x8] sm:$0xff]  ;;  %v21_v6 = vld [vmem:[%s4168_s0 + $0x18] sm:$0xff] }
   0x3   :  { %2192 = vmatpush3.bf16.msra.mxu0 %v2355_v0  ;;  %v82_v4 = vpack.c.bf16 %v19_v3, %v18_v2  ;;  %v22_v7 = vld [vmem:[%s4168_s0 + $0x20] sm:$0xff]  ;;  %v23_v8 = vld [vmem:[%s4168_s0 + $0x28] sm:$0xff]  ;;  %v83_v9 = vpack.c.bf16 %v21_v6, %v20_v5  ;;  %v24_v11 = vld [vmem:[%s4168_s0 + $0x30] sm:$0xff] }
   0x4   :  { %2193 = vmatprep.subr.bf16.mxu0 %v2356_v1  ;;  %v84_v10 = vpack.c.bf16 %v23_v8, %v22_v7  ;;  %v25_v12 = vld [vmem:[%s4168_s0 + $0x38] sm:$0xff]  ;;  %v26_v13 = vld [vmem:[%s4168_s0 + $0x40] sm:$0xff]  ;;  %v27_v14 = vld [vmem:[%s4168_s0 + $0x48] sm:$0xff] }
   0x5   :  { %2195 = vmatprep.mubr.msk.bf16.mxu0 %vm135_vm0, %v82_v4  ;;  %v85_v15 = vpack.c.bf16 %v25_v12, %v24_v11  ;;  %v86_v16 = vpack.c.bf16 %v27_v14, %v26_v13  ;;  %v28_v17 = vld [vmem:[%s4168_s0 + $0x50] sm:$0xff]  ;;  %v29_v18 = vld [vmem:[%s4168_s0 + $0x58] sm:$0xff]  ;;  %v30_v19 = vld [vmem:[%s4168_s0 + $0x60] sm:$0xff] }
   0x6   :  { %v31_v20 = vld [vmem:[%s4168_s0 + $0x68] sm:$0xff]  ;;  %v87_v21 = vpack.c.bf16 %v29_v18, %v28_v17  ;;  %v32_v23 = vld [vmem:[%s4168_s0 + $0x70] sm:$0xff]  ;;  %v33_v24 = vld [vmem:[%s4168_s0 + $0x78] sm:$0xff] }
   0x7   :  { %2194 = vmatpush3.bf16.msra.mxu0 %v2356_v1  ;;  %v88_v22 = vpack.c.bf16 %v31_v20, %v30_v19  ;;  %v34_v25 = vld [vmem:[%s4168_s0 + $0x80] sm:$0xff]  ;;  %v35_v26 = vld [vmem:[%s4168_s0 + $0x88] sm:$0xff]  ;;  %v89_v27 = vpack.c.bf16 %v33_v24, %v32_v23  ;;  %v36_v29 = vld [vmem:[%s4168_s0 + $0x90] sm:$0xff] }
   0x8   :  { %v90_v28 = vpack.c.bf16 %v35_v26, %v34_v25  ;;  %v37_v30 = vld [vmem:[%s4168_s0 + $0x98] sm:$0xff]  ;;  %v38_v31 = vld [vmem:[%s4168_s0 + $0xa0] sm:$0xff]  ;;  %v39_v32 = vld [vmem:[%s4168_s0 + $0xa8] sm:$0xff] }
   0x9   :  { %v91_v33 = vpack.c.bf16 %v37_v30, %v36_v29  ;;  %v92_v34 = vpack.c.bf16 %v39_v32, %v38_v31  ;;  %v40_v35 = vld [vmem:[%s4168_s0 + $0xb0] sm:$0xff]  ;;  %v41_v36 = vld [vmem:[%s4168_s0 + $0xb8] sm:$0xff]  ;;  %v42_v37 = vld [vmem:[%s4168_s0 + $0xc0] sm:$0xff] }
   0xa   :  { %2196 = vmatmul.mubr.msk.bf16.vlgmr.msra.gmra.mrb[0].mxu0 %vm135_vm0, %v83_v9  ;;  %v43_v38 = vld [vmem:[%s4168_s0 + $0xc8] sm:$0xff]  ;;  %v93_v39 = vpack.c.bf16 %v41_v36, %v40_v35  ;;  %v44_v41 = vld [vmem:[%s4168_s0 + $0xd0] sm:$0xff]  ;;  %v45_v42 = vld [vmem:[%s4168_s0 + $0xd8] sm:$0xff] }
   0xb   :  { %2199 = vmatprep.mubr.msk.bf16.mxu0 %vm135_vm0, %v84_v10  ;;  %v94_v40 = vpack.c.bf16 %v43_v38, %v42_v37  ;;  %v46_v43 = vld [vmem:[%s4168_s0 + $0xe0] sm:$0xff]  ;;  %v47_v44 = vld [vmem:[%s4168_s0 + $0xe8] sm:$0xff]  ;;  %v95_v45 = vpack.c.bf16 %v45_v42, %v44_v41  ;;  %v48_v47 = vld [vmem:[%s4168_s0 + $0xf0] sm:$0xff] }
   0xc   :  { %v96_v46 = vpack.c.bf16 %v47_v44, %v46_v43  ;;  %v49_v48 = vld [vmem:[%s4168_s0 + $0xf8] sm:$0xff]  ;;  %v50_v49 = vld [vmem:[%s4168_s0 + $0x100] sm:$0xff]  ;;  %v51_v50 = vld [vmem:[%s4168_s0 + $0x108] sm:$0xff] }
   0xd   :  { %v97_v51 = vpack.c.bf16 %v49_v48, %v48_v47  ;;  %v98_v52 = vpack.c.bf16 %v51_v50, %v50_v49  ;;  %v52_v53 = vld [vmem:[%s4168_s0 + $0x110] sm:$0xff]  ;;  %v53_v54 = vld [vmem:[%s4168_s0 + $0x118] sm:$0xff]  ;;  %v54_v55 = vld [vmem:[%s4168_s0 + $0x120] sm:$0xff] }
   0xe   :  { %v55_v56 = vld [vmem:[%s4168_s0 + $0x128] sm:$0xff]  ;;  %v99_v57 = vpack.c.bf16 %v53_v54, %v52_v53  ;;  %v56_v59 = vld [vmem:[%s4168_s0 + $0x130] sm:$0xff]  ;;  %v57_v60 = vld [vmem:[%s4168_s0 + $0x138] sm:$0xff] }
   0xf   :  { %v100_v58 = vpack.c.bf16 %v55_v56, %v54_v55  ;;  %v58_v61 = vld [vmem:[%s4168_s0 + $0x140] sm:$0xff]  ;;  %v59_v62 = vld [vmem:[%s4168_s0 + $0x148] sm:$0xff]  ;;  %v101_v63 = vpack.c.bf16 %v57_v60, %v56_v59  ;;  %v60_v1 = vld [vmem:[%s4168_s0 + $0x150] sm:$0xff] }
  0x10   :  { %v102_v0 = vpack.c.bf16 %v59_v62, %v58_v61  ;;  %v61_v2 = vld [vmem:[%s4168_s0 + $0x158] sm:$0xff]  ;;  %v62_v3 = vld [vmem:[%s4168_s0 + $0x160] sm:$0xff]  ;;  %v63_v4 = vld [vmem:[%s4168_s0 + $0x168] sm:$0xff] }
  0x11   :  { %v103_v5 = vpack.c.bf16 %v61_v2, %v60_v1  ;;  %v104_v6 = vpack.c.bf16 %v63_v4, %v62_v3  ;;  %v64_v7 = vld [vmem:[%s4168_s0 + $0x170] sm:$0xff]  ;;  %v65_v8 = vld [vmem:[%s4168_s0 + $0x178] sm:$0xff]  ;;  %v66_v9 = vld [vmem:[%s4168_s0 + $0x180] sm:$0xff] }
  0x12   :  { %2200 = vmatmul.mubr.msk.bf16.gmra.mrb[4].mxu0 %vm135_vm0, %v85_v15  ;;  %v67_v10 = vld [vmem:[%s4168_s0 + $0x188] sm:$0xff]  ;;  %v105_v11 = vpack.c.bf16 %v65_v8, %v64_v7  ;;  %v68_v13 = vld [vmem:[%s4168_s0 + $0x190] sm:$0xff]  ;;  %v69_v14 = vld [vmem:[%s4168_s0 + $0x198] sm:$0xff] }
  0x13   :  { %2203 = vmatprep.mubr.msk.bf16.mxu0 %vm135_vm0, %v86_v16  ;;  %v106_v12 = vpack.c.bf16 %v67_v10, %v66_v9  ;;  %v70_v15 = vld [vmem:[%s4168_s0 + $0x1a0] sm:$0xff]  ;;  %v71_v16 = vld [vmem:[%s4168_s0 + $0x1a8] sm:$0xff]  ;;  %v107_v17 = vpack.c.bf16 %v69_v14, %v68_v13  ;;  %v72_v19 = vld [vmem:[%s4168_s0 + $0x1b0] sm:$0xff] }
  0x14   :  { %v108_v18 = vpack.c.bf16 %v71_v16, %v70_v15  ;;  %v73_v20 = vld [vmem:[%s4168_s0 + $0x1b8] sm:$0xff]  ;;  %v76_v25 = vld [vmem:[%s4168_s0 + $0x1d0] sm:$0xff]  ;;  %v2755_v37 = vld [vmem:[%s4169_s2] sm:$0xff] }
  0x15   :  { %v109_v23 = vpack.c.bf16 %v73_v20, %v72_v19  ;;  %v77_v26 = vld [vmem:[%s4168_s0 + $0x1d8] sm:$0xff]  ;;  %v80_v31 = vld [vmem:[%s4168_s0 + $0x1f0] sm:$0xff]  ;;  %v2358_v10 = vld [vmem:[%s4170_s3 + $0x8] sm:$0xff]  }
  0x16   :  { %v111_v29 = vpack.c.bf16 %v77_v26, %v76_v25  ;;  %v81_v32 = vld [vmem:[%s4168_s0 + $0x1f8] sm:$0xff]  ;;  %v2359_v15 = vld [vmem:[%s4170_s3 + $0x10] sm:$0xff]   ;;  %v2361_v25 = vld [vmem:[%s4170_s3 + $0x20] sm:$0xff]  }
  0x17   :  { %v2360_v19 = vld [vmem:[%s4170_s3 + $0x18] sm:$0xff]  }
  0x1a   :  { %2204 = vmatmul.mubr.msk.bf16.gmra.mrb[8].mxu0 %vm135_vm0, %v87_v21  ;;  %v74_v21 = vld [vmem:[%s4168_s0 + $0x1c0] sm:$0xff] }
  0x1b   :  { %2207 = vmatprep.mubr.msk.bf16.mxu0 %vm135_vm0, %v88_v22  ;;  %v75_v22 = vld [vmem:[%s4168_s0 + $0x1c8] sm:$0xff] }
  0x1c   :  { %v110_v24 = vpack.c.bf16 %v75_v22, %v74_v21 }
  0x22   :  { %2208 = vmatmul.mubr.msk.bf16.gmra.mrb[12].mxu0 %vm135_vm0, %v89_v27  ;;  %v78_v27 = vld [vmem:[%s4168_s0 + $0x1e0] sm:$0xff] }
  0x23   :  { %2211 = vmatprep.mubr.msk.bf16.mxu0 %vm135_vm0, %v90_v28  ;;  %v79_v28 = vld [vmem:[%s4168_s0 + $0x1e8] sm:$0xff] }
  0x24   :  { %v112_v30 = vpack.c.bf16 %v79_v28, %v78_v27 }
  0x2a   :  { %2212 = vmatmul.mubr.msk.bf16.gmra.mrb[16].mxu0 %vm135_vm0, %v91_v33  ;;  %v113_v33 = vpack.c.bf16 %v81_v32, %v80_v31 }
  0x2b   :  { %2215 = vmatprep.mubr.msk.bf16.mxu0 %vm135_vm0, %v92_v34  ;;  %v119_v34 = vlaneseq }
  0x2d   :  { %v2749_v35 = vshrl.u32 %v119_v34, 7 }
  0x2f   :  { %4199 = vst [vmem:[#allocation2_spill] sm:$0xff] %v2749_v35  ;;  %v121_v36 = vsub.s32 0, %v2749_v35 }
  0x31   :  { %v2758_v38 = vrot.slane %v2755_v37, %v121_v36  ;;  %v2363_v36 = vld [vmem:[%s4170_s3 + $0x30] sm:$0xff]  }
  0x32   :  { %2216 = vmatmul.mubr.msk.bf16.gmra.mrb[20].mxu0 %vm135_vm0, %v93_v39 }
  0x33   :  { %2219 = vmatprep.mubr.msk.bf16.mxu0 %vm135_vm0, %v94_v40 }
  0x3a   :  { %2220 = vmatmul.mubr.msk.bf16.gmra.mrb[24].mxu0 %vm135_vm0, %v95_v45 }
  0x3b   :  { %2223 = vmatprep.mubr.msk.bf16.mxu0 %vm135_vm0, %v96_v46 }
  0x42   :  { %2224 = vmatmul.mubr.msk.bf16.gmra.mrb[28].mxu0 %vm135_vm0, %v97_v51 }
  0x43   :  { %2227 = vmatprep.mubr.msk.bf16.mxu0 %vm135_vm0, %v98_v52 }
  0x4a   :  { %2228 = vmatmul.mubr.msk.bf16.gmra.mrb[32].mxu0 %vm135_vm0, %v99_v57 }
  0x4b   :  { %2231 = vmatprep.mubr.msk.bf16.mxu0 %vm135_vm0, %v100_v58 }
  0x52   :  { %2232 = vmatmul.mubr.msk.bf16.gmra.mrb[36].mxu0 %vm135_vm0, %v101_v63 }
  0x53   :  { %2235 = vmatprep.mubr.msk.bf16.mxu0 %vm135_vm0, %v102_v0 }
  0x5a   :  { %2236 = vmatmul.mubr.msk.bf16.gmra.mrb[40].mxu0 %vm135_vm0, %v103_v5  ;;  %v2357_v5 = vld [vmem:[%s4170_s3] sm:$0xff]  }
  0x5b   :  { %2239 = vmatprep.mubr.msk.bf16.mxu0 %vm135_vm0, %v104_v6  ;;  %2259 = vmatprep.subr.bf16.mxu0 %v2357_v5 }
  0x5c   :  { %2260 = vmatpush3.bf16.msra.mxu0 %v2357_v5  ;;  %2339 = vmatprep.subr.bf16.mxu1 %v2357_v5 }
  0x5d   :  { %2347 = vmatpush3.bf16.msra.mxu1 %v2357_v5  ;;  %2261 = vmatprep.subr.bf16.mxu0 %v2358_v10 }
  0x5e   :  { %2340 = vmatprep.subr.bf16.mxu1 %v2358_v10 }
  0x60   :  { %2262 = vmatpush3.bf16.msra.mxu0 %v2358_v10 }
  0x61   :  { %2348 = vmatpush3.bf16.msra.mxu1 %v2358_v10  ;;  %2263 = vmatprep.subr.bf16.mxu0 %v2359_v15 }
  0x62   :  { %2240 = vmatmul.mubr.msk.bf16.gmra.mrb[44].mxu0 %vm135_vm0, %v105_v11  ;;  %2341 = vmatprep.subr.bf16.mxu1 %v2359_v15 }
  0x63   :  { %2243 = vmatprep.mubr.msk.bf16.mxu0 %vm135_vm0, %v106_v12 }
  0x64   :  { %2264 = vmatpush3.bf16.msra.mxu0 %v2359_v15 }
  0x65   :  { %2349 = vmatpush3.bf16.msra.mxu1 %v2359_v15  ;;  %2265 = vmatprep.subr.bf16.mxu0 %v2360_v19 }
  0x66   :  { %2342 = vmatprep.subr.bf16.mxu1 %v2360_v19 }
  0x68   :  { %2266 = vmatpush3.bf16.msra.mxu0 %v2360_v19 }
  0x69   :  { %2350 = vmatpush3.bf16.msra.mxu1 %v2360_v19  ;;  %2267 = vmatprep.subr.bf16.mxu0 %v2361_v25 }
  0x6a   :  { %2244 = vmatmul.mubr.msk.bf16.gmra.mrb[48].mxu0 %vm135_vm0, %v107_v17  ;;  %2343 = vmatprep.subr.bf16.mxu1 %v2361_v25 }
  0x6b   :  { %2247 = vmatprep.mubr.msk.bf16.mxu0 %vm135_vm0, %v108_v18 }
  0x6c   :  { %2268 = vmatpush3.bf16.msra.mxu0 %v2361_v25 }
  0x6d   :  { %2351 = vmatpush3.bf16.msra.mxu1 %v2361_v25 }
  0x72   :  { %2248 = vmatmul.mubr.msk.bf16.gmra.mrb[52].mxu0 %vm135_vm0, %v109_v23 }
  0x73   :  { %2251 = vmatprep.mubr.msk.bf16.mxu0 %vm135_vm0, %v110_v24 }
  0x7a   :  { %2252 = vmatmul.mubr.msk.bf16.gmra.mrb[56].mxu0 %vm135_vm0, %v111_v29 }
  0x7b   :  { %2255 = vmatprep.mubr.msk.bf16.mxu0 %vm135_vm0, %v112_v30  ;;  %v2362_v30 = vld [vmem:[%s4170_s3 + $0x28] sm:$0xff]  }
  0x7c   :  { %2269 = vmatprep.subr.bf16.mxu0 %v2362_v30  ;;  %2344 = vmatprep.subr.bf16.mxu1 %v2362_v30 }
  0x7d   :  { %2270 = vmatpush3.bf16.msra.mxu0 %v2362_v30  ;;  %2352 = vmatpush3.bf16.msra.mxu1 %v2362_v30 }
  0x7e   :  { %2271 = vmatprep.subr.bf16.mxu0 %v2363_v36  ;;  %2345 = vmatprep.subr.bf16.mxu1 %v2363_v36 }
  0x81   :  { %2272 = vmatpush3.bf16.msra.mxu0 %v2363_v36  ;;  %2353 = vmatpush3.bf16.msra.mxu1 %v2363_v36 }
  0x82   :  { %2256 = vmatmul.mubr.msk.bf16.gmra.mrb[60].mxu0 %vm135_vm0, %v113_v33 }
  0xdd   :  { %v2197_v39 = vpop.f32.mrb[0].mxu0 }
  0xde   :  { %v2761_v40 = vadd.f32 %v2197_v39, %v2758_v38  ;;  %v266_v41 = vpop.f32.mrb[1].mxu0 }
  0xdf   :  { %v2198_v42 = vpop.f32.mrb[2].mxu0  ;;  %v2768_v45 = vadd.f32 %v266_v41, %v2758_v38 }
  0xe0   :  { %v2764_v43 = vadd.f32 %v2198_v42, %v2758_v38  ;;  %525 = vadd.xlane.f32.xlu0 %v2761_v40  ;;  %v269_v44 = vpop.f32.mrb[3].mxu0  ;;  %v715_v48 = vmul.f32 %v2761_v40, %v2761_v40 }
  0xe1   :  { %v2772_v46 = vadd.f32 %v269_v44, %v2758_v38  ;;  %v713_v53 = vmul.f32 %v2768_v45, %v2768_v45  ;;  %v2364_v44 = vld [vmem:[%s4170_s3 + $0x38] sm:$0xff]  }
  0xe2   :  { %527 = vadd.xlane.f32.xlu1 %v2764_v43  ;;  %v716_v51 = vmul.f32 %v2764_v43, %v2764_v43  ;;  %2273 = vmatprep.subr.bf16.mxu0 %v2364_v44 }
  0xe3   :  { %v714_v56 = vmul.f32 %v2772_v46, %v2772_v46  ;;  %2346 = vmatprep.subr.bf16.mxu1 %v2364_v44  ;;  %2274 = vmatpush3.bf16.msra.mxu0 %v2364_v44 }
  0xe4   :  { %521 = vadd.xlane.f32.xlu0 %v2768_v45  ;;  %2354 = vmatpush3.bf16.msra.mxu1 %v2364_v44 }
  0xe5   :  { %v2201_v47 = vpop.f32.mrb[4].mxu0 }
  0xe6   :  { %523 = vadd.xlane.f32.xlu1 %v2772_v46  ;;  %v282_v49 = vpop.f32.mrb[5].mxu0  ;;  %v2783_v54 = vadd.f32 %v2201_v47, %v2758_v38 }
  0xe7   :  { %v2202_v50 = vpop.f32.mrb[6].mxu0  ;;  %v2786_v55 = vadd.f32 %v282_v49, %v2758_v38 }
  0xe8   :  { %781 = vadd.xlane.f32.xlu0 %v715_v48  ;;  %v285_v52 = vpop.f32.mrb[7].mxu0  ;;  %v719_v60 = vmul.f32 %v2783_v54, %v2783_v54  ;;  %v2795_v62 = vadd.f32 %v2202_v50, %v2758_v38 }
  0xe9   :  { %v2798_v0 = vadd.f32 %v285_v52, %v2758_v38  ;;  %v717_v6 = vmul.f32 %v2786_v55, %v2786_v55 }
  0xea   :  { %783 = vadd.xlane.f32.xlu1 %v716_v51  ;;  %v720_v3 = vmul.f32 %v2795_v62, %v2795_v62 }
  0xeb   :  { %v718_v8 = vmul.f32 %v2798_v0, %v2798_v0 }
  0xec   :  { %777 = vadd.xlane.f32.xlu0 %v713_v53 }
  0xed   :  { %v2205_v57 = vpop.f32.mrb[8].mxu0 }
  0xee   :  { %779 = vadd.xlane.f32.xlu1 %v714_v56  ;;  %v298_v58 = vpop.f32.mrb[9].mxu0  ;;  %v2816_v7 = vadd.f32 %v2205_v57, %v2758_v38 }
  0xef   :  { %v2206_v59 = vpop.f32.mrb[10].mxu0  ;;  %v2839_v16 = vadd.f32 %v298_v58, %v2758_v38 }
  0xf0   :  { %529 = vadd.xlane.f32.xlu0 %v2786_v55  ;;  %v301_v61 = vpop.f32.mrb[11].mxu0  ;;  %v2830_v13 = vadd.f32 %v2206_v59, %v2758_v38  ;;  %v723_v20 = vmul.f32 %v2816_v7, %v2816_v7 }
  0xf1   :  { %v2843_v17 = vadd.f32 %v301_v61, %v2758_v38  ;;  %v721_v26 = vmul.f32 %v2839_v16, %v2839_v16 }
  0xf2   :  { %533 = vadd.xlane.f32.xlu1 %v2783_v54  ;;  %v724_v23 = vmul.f32 %v2830_v13, %v2830_v13 }
  0xf3   :  { %v722_v28 = vmul.f32 %v2843_v17, %v2843_v17 }
  0xf4   :  { %789 = vadd.xlane.f32.xlu0 %v719_v60 }
  0xf5   :  { %v2209_v63 = vpop.f32.mrb[12].mxu0 }
  0xf6   :  { %535 = vadd.xlane.f32.xlu1 %v2795_v62  ;;  %v2801_v1 = vpop.f32.mrb[13].mxu0  ;;  %v2868_v27 = vadd.f32 %v2209_v63, %v2758_v38 }
  0xf7   :  { %v2803_v2 = vpop.f32.mrb[14].mxu0  ;;  %v2893_v39 = vadd.f32 %v2801_v1, %v2758_v38 }
  0xf8   :  { %531 = vadd.xlane.f32.xlu0 %v2798_v0  ;;  %v2808_v4 = vpop.f32.mrb[15].mxu0  ;;  %v2883_v33 = vadd.f32 %v2803_v2, %v2758_v38  ;;  %v727_v47 = vmul.f32 %v2868_v27, %v2868_v27 }
  0xf9   :  { %v2898_v41 = vadd.f32 %v2808_v4, %v2758_v38  ;;  %v725_v52 = vmul.f32 %v2893_v39, %v2893_v39 }
  0xfa   :  { %791 = vadd.xlane.f32.xlu1 %v720_v3  ;;  %v728_v50 = vmul.f32 %v2883_v33, %v2883_v33 }
  0xfb   :  { %v726_v56 = vmul.f32 %v2898_v41, %v2898_v41 }
  0xfc   :  { %785 = vadd.xlane.f32.xlu0 %v717_v6 }
  0xfd   :  { %v2820_v9 = vpop.f32.mrb[16].mxu0 }
  0xfe   :  { %787 = vadd.xlane.f32.xlu1 %v718_v8  ;;  %v2825_v11 = vpop.f32.mrb[17].mxu0  ;;  %v2921_v53 = vadd.f32 %v2820_v9, %v2758_v38 }
  0xff   :  { %v2827_v12 = vpop.f32.mrb[18].mxu0  ;;  %v2940_v63 = vadd.f32 %v2825_v11, %v2758_v38 }
 0x100   :  { %541 = vadd.xlane.f32.xlu0 %v2816_v7  ;;  %v2833_v14 = vpop.f32.mrb[19].mxu0  ;;  %4200 = vst [vmem:[#allocation3_spill] sm:$0xff] %v2921_v53  ;;  %v2933_v60 = vadd.f32 %v2827_v12, %v2758_v38  ;;  %v731_v3 = vmul.f32 %v2921_v53, %v2921_v53 }
 0x101   :  { %4202 = vst [vmem:[#allocation5_spill] sm:$0xff] %v2940_v63  ;;  %v2945_v1 = vadd.f32 %v2833_v14, %v2758_v38  ;;  %v729_v9 = vmul.f32 %v2940_v63, %v2940_v63 }
 0x102   :  { %543 = vadd.xlane.f32.xlu1 %v2830_v13  ;;  %4201 = vst [vmem:[#allocation4_spill] sm:$0xff] %v2933_v60  ;;  %v732_v6 = vmul.f32 %v2933_v60, %v2933_v60 }
 0x103   :  { %4203 = vst [vmem:[#allocation6_spill] sm:$0xff] %v2945_v1  ;;  %v730_v11 = vmul.f32 %v2945_v1, %v2945_v1 }
 0x104   :  { %537 = vadd.xlane.f32.xlu0 %v2839_v16 }
 0x105   :  { %v2846_v18 = vpop.f32.mrb[20].mxu0 }
 0x106   :  { %539 = vadd.xlane.f32.xlu1 %v2843_v17  ;;  %v2854_v21 = vpop.f32.mrb[21].mxu0  ;;  %v2965_v10 = vadd.f32 %v2846_v18, %v2758_v38 }
 0x107   :  { %v2856_v22 = vpop.f32.mrb[22].mxu0  ;;  %v2984_v18 = vadd.f32 %v2854_v21, %v2758_v38 }
 0x108   :  { %797 = vadd.xlane.f32.xlu0 %v723_v20  ;;  %v2860_v24 = vpop.f32.mrb[23].mxu0  ;;  %4204 = vst [vmem:[#allocation7_spill] sm:$0xff] %v2965_v10  ;;  %v2977_v19 = vadd.f32 %v2856_v22, %v2758_v38  ;;  %v735_v22 = vmul.f32 %v2965_v10, %v2965_v10 }
 0x109   :  { %4206 = vst [vmem:[#allocation9_spill] sm:$0xff] %v2984_v18 }
 0x10a   :  { %799 = vadd.xlane.f32.xlu1 %v724_v23  ;;  %4205 = vst [vmem:[#allocation8_spill] sm:$0xff] %v2977_v19  ;;  %v2989_v23 = vadd.f32 %v2860_v24, %v2758_v38  ;;  %v736_v21 = vmul.f32 %v2977_v19, %v2977_v19  ;;  %v733_v24 = vmul.f32 %v2984_v18, %v2984_v18 }
 0x10c   :  { %793 = vadd.xlane.f32.xlu0 %v721_v26  ;;  %4207 = vst [vmem:[#allocation10_spill] sm:$0xff] %v2989_v23  ;;  %v734_v44 = vmul.f32 %v2989_v23, %v2989_v23 }
 0x10d   :  { %v2872_v29 = vpop.f32.mrb[24].mxu0 }
 0x10e   :  { %795 = vadd.xlane.f32.xlu1 %v722_v28  ;;  %v2877_v31 = vpop.f32.mrb[25].mxu0  ;;  %v3009_v36 = vadd.f32 %v2872_v29, %v2758_v38 }
 0x10f   :  { %v2879_v32 = vpop.f32.mrb[26].mxu0  ;;  %v3028_v29 = vadd.f32 %v2877_v31, %v2758_v38 }
 0x110   :  { %549 = vadd.xlane.f32.xlu0 %v2868_v27  ;;  %v2886_v34 = vpop.f32.mrb[27].mxu0  ;;  %4208 = vst [vmem:[#allocation11_spill] sm:$0xff] %v3009_v36 }
 0x111   :  { %4210 = vst [vmem:[#allocation13_spill] sm:$0xff] %v3028_v29 }
 0x112   :  { %551 = vadd.xlane.f32.xlu1 %v2883_v33 }
 0x114   :  { %545 = vadd.xlane.f32.xlu0 %v2893_v39 }
 0x115   :  { %v2901_v42 = vpop.f32.mrb[28].mxu0 }
 0x116   :  { %547 = vadd.xlane.f32.xlu1 %v2898_v41  ;;  %v2909_v48 = vpop.f32.mrb[29].mxu0 }
 0x117   :  { %v2911_v49 = vpop.f32.mrb[30].mxu0 }
 0x118   :  { %805 = vadd.xlane.f32.xlu0 %v727_v47  ;;  %v2915_v51 = vpop.f32.mrb[31].mxu0 }
 0x11a   :  { %807 = vadd.xlane.f32.xlu1 %v728_v50 }
 0x11c   :  { %801 = vadd.xlane.f32.xlu0 %v725_v52 }
 0x11d   :  { %v2925_v57 = vpop.f32.mrb[32].mxu0 }
 0x11e   :  { %803 = vadd.xlane.f32.xlu1 %v726_v56  ;;  %v2927_v58 = vpop.f32.mrb[33].mxu0  ;;  %v3021_v56 = vadd.f32 %v2879_v32, %v2758_v38  ;;  %v739_v32 = vmul.f32 %v3009_v36, %v3009_v36 }
 0x11f   :  { %v2929_v59 = vpop.f32.mrb[34].mxu0 }
 0x120   :  { %557 = vadd.xlane.f32.xlu0 %v2921_v53  ;;  %v2936_v61 = vpop.f32.mrb[35].mxu0  ;;  %4209 = vst [vmem:[#allocation12_spill] sm:$0xff] %v3021_v56  ;;  %v740_v31 = vmul.f32 %v3021_v56, %v3021_v56 }
 0x122   :  { %559 = vadd.xlane.f32.xlu1 %v2933_v60 }
 0x124   :  { %553 = vadd.xlane.f32.xlu0 %v2940_v63 }
 0x125   :  { %v2948_v2 = vpop.f32.mrb[36].mxu0 }
 0x126   :  { %555 = vadd.xlane.f32.xlu1 %v2945_v1  ;;  %v2953_v4 = vpop.f32.mrb[37].mxu0 }
 0x127   :  { %v2955_v5 = vpop.f32.mrb[38].mxu0 }
 0x128   :  { %813 = vadd.xlane.f32.xlu0 %v731_v3  ;;  %v2959_v8 = vpop.f32.mrb[39].mxu0 }
 0x12a   :  { %815 = vadd.xlane.f32.xlu1 %v732_v6  ;;  %v3033_v6 = vadd.f32 %v2886_v34, %v2758_v38  ;;  %v737_v34 = vmul.f32 %v3028_v29, %v3028_v29 }
 0x12c   :  { %809 = vadd.xlane.f32.xlu0 %v729_v9  ;;  %4211 = vst [vmem:[#allocation14_spill] sm:$0xff] %v3033_v6 }
 0x12d   :  { %v2969_v12 = vpop.f32.mrb[40].mxu0 }
 0x12e   :  { %811 = vadd.xlane.f32.xlu1 %v730_v11  ;;  %v2971_v14 = vpop.f32.mrb[41].mxu0 }
 0x12f   :  { %v2973_v15 = vpop.f32.mrb[42].mxu0 }
 0x130   :  { %565 = vadd.xlane.f32.xlu0 %v2965_v10  ;;  %v2980_v20 = vpop.f32.mrb[43].mxu0 }
 0x132   :  { %567 = vadd.xlane.f32.xlu1 %v2977_v19  ;;  %v3097_v19 = vadd.f32 %v2925_v57, %v2758_v38  ;;  %v3113_v57 = vadd.f32 %v2936_v61, %v2758_v38 }
 0x134   :  { %561 = vadd.xlane.f32.xlu0 %v2984_v18  ;;  %4220 = vst [vmem:[#allocation23_spill] sm:$0xff] %v3097_v19  ;;  %4223 = vst [vmem:[#allocation26_spill] sm:$0xff] %v3113_v57  ;;  %v746_v61 = vmul.f32 %v3113_v57, %v3113_v57 }
 0x135   :  { %v2992_v25 = vpop.f32.mrb[44].mxu0 }
 0x136   :  { %563 = vadd.xlane.f32.xlu1 %v2989_v23  ;;  %v2997_v26 = vpop.f32.mrb[45].mxu0 }
 0x137   :  { %v2999_v28 = vpop.f32.mrb[46].mxu0 }
 0x138   :  { %821 = vadd.xlane.f32.xlu0 %v735_v22  ;;  %v3003_v30 = vpop.f32.mrb[47].mxu0 }
 0x13a   :  { %823 = vadd.xlane.f32.xlu1 %v736_v21 }
 0x13c   :  { %817 = vadd.xlane.f32.xlu0 %v733_v24  ;;  %v3053_v24 = vadd.f32 %v2901_v42, %v2758_v38  ;;  %v3072_v42 = vadd.f32 %v2909_v48, %v2758_v38 }
 0x13d   :  { %v3013_v47 = vpop.f32.mrb[48].mxu0 }
 0x13e   :  { %819 = vadd.xlane.f32.xlu1 %v734_v44  ;;  %v3015_v50 = vpop.f32.mrb[49].mxu0  ;;  %4212 = vst [vmem:[#allocation15_spill] sm:$0xff] %v3053_v24  ;;  %v738_v44 = vmul.f32 %v3033_v6, %v3033_v6  ;;  %4214 = vst [vmem:[#allocation17_spill] sm:$0xff] %v3072_v42 }
 0x13f   :  { %v3017_v52 = vpop.f32.mrb[50].mxu0 }
 0x140   :  { %573 = vadd.xlane.f32.xlu0 %v3009_v36  ;;  %v3024_v3 = vpop.f32.mrb[51].mxu0 }
 0x142   :  { %575 = vadd.xlane.f32.xlu1 %v3021_v56 }
 0x144   :  { %569 = vadd.xlane.f32.xlu0 %v3028_v29 }
 0x145   :  { %v3036_v9 = vpop.f32.mrb[52].mxu0 }
 0x146   :  { %571 = vadd.xlane.f32.xlu1 %v3033_v6  ;;  %v3041_v11 = vpop.f32.mrb[53].mxu0 }
 0x147   :  { %v3043_v22 = vpop.f32.mrb[54].mxu0 }
 0x148   :  { %829 = vadd.xlane.f32.xlu0 %v739_v32  ;;  %v3047_v21 = vpop.f32.mrb[55].mxu0 }
 0x14a   :  { %831 = vadd.xlane.f32.xlu1 %v740_v31  ;;  %v3065_v31 = vadd.f32 %v2911_v49, %v2758_v38  ;;  %v743_v49 = vmul.f32 %v3053_v24, %v3053_v24 }
 0x14c   :  { %825 = vadd.xlane.f32.xlu0 %v737_v34  ;;  %4213 = vst [vmem:[#allocation16_spill] sm:$0xff] %v3065_v31  ;;  %v3077_v34 = vadd.f32 %v2915_v51, %v2758_v38  ;;  %v744_v48 = vmul.f32 %v3065_v31, %v3065_v31  ;;  %v741_v51 = vmul.f32 %v3072_v42, %v3072_v42 }
 0x14d   :  { %v3057_v36 = vpop.f32.mrb[56].mxu0 }
 0x14e   :  { %827 = vadd.xlane.f32.xlu1 %v738_v44  ;;  %v3059_v32 = vpop.f32.mrb[57].mxu0  ;;  %4215 = vst [vmem:[#allocation18_spill] sm:$0xff] %v3077_v34 }
 0x14f   :  { %v3061_v56 = vpop.f32.mrb[58].mxu0 }
 0x150   :  { %581 = vadd.xlane.f32.xlu0 %v3053_v24  ;;  %v3068_v29 = vpop.f32.mrb[59].mxu0  ;;  %v742_v24 = vmul.f32 %v3077_v34, %v3077_v34 }
 0x152   :  { %583 = vadd.xlane.f32.xlu1 %v3065_v31 }
 0x154   :  { %577 = vadd.xlane.f32.xlu0 %v3072_v42 }
 0x155   :  { %v3080_v44 = vpop.f32.mrb[60].mxu0 }
 0x156   :  { %4216 = vst [vmem:[#allocation19_spill] sm:$0xff] %v3080_v44  ;;  %579 = vadd.xlane.f32.xlu1 %v3077_v34  ;;  %v3085_v6 = vpop.f32.mrb[61].mxu0 }
 0x157   :  { %4217 = vst [vmem:[#allocation20_spill] sm:$0xff] %v3085_v6  ;;  %v3087_v23 = vpop.f32.mrb[62].mxu0 }
 0x158   :  { %4218 = vst [vmem:[#allocation21_spill] sm:$0xff] %v3087_v23  ;;  %837 = vadd.xlane.f32.xlu0 %v743_v49  ;;  %v3091_v18 = vpop.f32.mrb[63].mxu0  ;;  %v3103_v49 = vadd.f32 %v2929_v59, %v2758_v38  ;;  %v747_v59 = vmul.f32 %v3097_v19, %v3097_v19 }
 0x159   :  { %4219 = vst [vmem:[#allocation22_spill] sm:$0xff] %v3091_v18 }
 0x15a   :  { %839 = vadd.xlane.f32.xlu1 %v744_v48  ;;  %4221 = vst [vmem:[#allocation24_spill] sm:$0xff] %v3103_v49  ;;  %v3108_v48 = vadd.f32 %v2927_v58, %v2758_v38 }
 0x15c   :  { %833 = vadd.xlane.f32.xlu0 %v741_v51  ;;  %4222 = vst [vmem:[#allocation25_spill] sm:$0xff] %v3108_v48  ;;  %v745_v58 = vmul.f32 %v3108_v48, %v3108_v48  ;;  %v3125_v51 = vadd.f32 %v2948_v2, %v2758_v38 }
 0x15e   :  { %835 = vadd.xlane.f32.xlu1 %v742_v24  ;;  %v748_v24 = vmul.f32 %v3103_v49, %v3103_v49  ;;  %4224 = vst [vmem:[#allocation27_spill] sm:$0xff] %v3125_v51 }
 0x160   :  { %589 = vadd.xlane.f32.xlu0 %v3097_v19 }
 0x162   :  { %591 = vadd.xlane.f32.xlu1 %v3103_v49 }
 0x164   :  { %585 = vadd.xlane.f32.xlu0 %v3108_v48  ;;  %v3136_v48 = vadd.f32 %v2953_v4, %v2758_v38 }
 0x166   :  { %587 = vadd.xlane.f32.xlu1 %v3113_v57  ;;  %4226 = vst [vmem:[#allocation29_spill] sm:$0xff] %v3136_v48 }
 0x168   :  { %845 = vadd.xlane.f32.xlu0 %v747_v59  ;;  %v3131_v59 = vadd.f32 %v2955_v5, %v2758_v38 }
 0x16a   :  { %847 = vadd.xlane.f32.xlu1 %v748_v24  ;;  %4225 = vst [vmem:[#allocation28_spill] sm:$0xff] %v3131_v59  ;;  %v752_v6 = vmul.f32 %v3131_v59, %v3131_v59 }
 0x16c   :  { %841 = vadd.xlane.f32.xlu0 %v745_v58 }
 0x16d   :  { %v526_v34 = vpop.xlane.xlu0 %525 }
 0x16e   :  { %843 = vadd.xlane.f32.xlu1 %v746_v61  ;;  %v3138_v2 = vmul.f32 0.015625, %v526_v34  ;;  %v3143_v61 = vadd.f32 %v2959_v8, %v2758_v38  ;;  %v751_v34 = vmul.f32 %v3125_v51, %v3125_v51 }
 0x16f   :  { %v528_v42 = vpop.xlane.xlu1 %527 }
 0x170   :  { %597 = vadd.xlane.f32.xlu0 %v3125_v51  ;;  %4227 = vst [vmem:[#allocation30_spill] sm:$0xff] %v3143_v61  ;;  %v3145_v57 = vmul.f32 0.015625, %v528_v42  ;;  %v971_v49 = vmul.f32 %v3138_v2, %v3138_v2 }
 0x171   :  { %v522_v24 = vpop.xlane.xlu0 %521 }
 0x172   :  { %599 = vadd.xlane.f32.xlu1 %v3131_v59  ;;  %v3150_v19 = vmul.f32 0.015625, %v522_v24  ;;  %v972_v42 = vmul.f32 %v3145_v57, %v3145_v57 }
 0x173   :  { %v524_v58 = vpop.xlane.xlu1 %523 }
 0x174   :  { %593 = vadd.xlane.f32.xlu0 %v3136_v48  ;;  %v3155_v31 = vmul.f32 0.015625, %v524_v58  ;;  %v969_v23 = vmul.f32 %v3150_v19, %v3150_v19 }
 0x175   :  { %v782_v5 = vpop.xlane.xlu0 %781 }
 0x176   :  { %v907_v4 = vmul.f32 0.015625, %v782_v5  ;;  %595 = vadd.xlane.f32.xlu1 %v3143_v61  ;;  %v749_v5 = vmul.f32 %v3136_v48, %v3136_v48  ;;  %v970_v44 = vmul.f32 %v3155_v31, %v3155_v31 }
 0x177   :  { %v784_v8 = vpop.xlane.xlu1 %783 }
 0x178   :  { %v1035_v10 = vsub.f32 %v907_v4, %v971_v49  ;;  %v908_v18 = vmul.f32 0.015625, %v784_v8  ;;  %853 = vadd.xlane.f32.xlu0 %v751_v34  ;;  %v3169_v49 = vadd.f32 %v2969_v12, %v2758_v38  ;;  %v750_v34 = vmul.f32 %v3143_v61, %v3143_v61 }
 0x179   :  { %v778_v24 = vpop.xlane.xlu0 %777 }
 0x17a   :  { %v1099_v51 = vmax.f32 %v1035_v10, 0.0  ;;  %v1036_v58 = vsub.f32 %v908_v18, %v972_v42  ;;  %v905_v1 = vmul.f32 0.015625, %v778_v24  ;;  %855 = vadd.xlane.f32.xlu1 %v752_v6  ;;  %v3175_v24 = vadd.f32 %v2973_v15, %v2758_v38 }
 0x17b   :  { %v780_v4 = vpop.xlane.xlu1 %779 }
 0x17c   :  { %v1227_v8 = vadd.f32 1e-05, %v1099_v51  ;;  %v1100_v48 = vmax.f32 %v1036_v58, 0.0  ;;  %v1033_v59 = vsub.f32 %v905_v1, %v969_v23  ;;  %v906_v63 = vmul.f32 0.015625, %v780_v4  ;;  %849 = vadd.xlane.f32.xlu0 %v749_v5 }
 0x17d   :  { %v530_v10 = vpop.xlane.xlu0 %529  ;;  %v3182_v23 = vadd.f32 %v2971_v14, %v2758_v38  ;;  %v1419_v51 = vsub.s32 1, %v2749_v35  ;;  %v755_v58 = vmul.f32 %v3169_v49, %v3169_v49 }
 0x17e   :  { %2365 = vrsqrt.f32 %v1227_v8  ;;  %v1228_v18 = vadd.f32 1e-05, %v1100_v48  ;;  %v1097_v6 = vmax.f32 %v1033_v59, 0.0  ;;  %v1034_v42 = vsub.f32 %v906_v63, %v970_v44  ;;  %851 = vadd.xlane.f32.xlu1 %v750_v34 }
 0x17f   :  { %v534_v12 = vpop.xlane.xlu1 %533  ;;  %4228 = vst [vmem:[#allocation31_spill] sm:$0xff] %v3182_v23  ;;  %v3190_v59 = vadd.f32 %v2980_v20, %v2758_v38  ;;  %v3195_v5 = vmul.f32 0.015625, %v530_v10  ;;  %v3203_v20 = vrot.slane %v2755_v37, %v1419_v51 }
 0x180   :  { %2367 = vrsqrt.f32 %v1228_v18  ;;  %v1225_v60 = vadd.f32 1e-05, %v1097_v6  ;;  %v1098_v53 = vmax.f32 %v1034_v42, 0.0  ;;  %v3177_v61 = vmul.f32 0.015625, %v534_v12  ;;  %605 = vadd.xlane.f32.xlu0 %v3169_v49 }
 0x181   :  { %v790_v1 = vpop.xlane.xlu0 %789  ;;  %4229 = vst [vmem:[#allocation32_spill] sm:$0xff] %v3190_v59  ;;  %v1487_v18 = vsub.s32 2, %v2749_v35  ;;  %v1163_v42 = vsub.f32 %v2761_v40, %v3138_v2  ;;  %v754_v51 = vmul.f32 %v3190_v59, %v3190_v59 }
 0x182   :  { %2369 = vrsqrt.f32 %v1225_v60  ;;  %v1226_v63 = vadd.f32 1e-05, %v1098_v53  ;;  %v975_v44 = vmul.f32 %v3177_v61, %v3177_v61  ;;  %607 = vadd.xlane.f32.xlu1 %v3175_v24  ;;  %v911_v15 = vmul.f32 0.015625, %v790_v1 }
 0x183   :  { %v536_v48 = vpop.xlane.xlu1 %535  ;;  %v756_v1 = vmul.f32 %v3175_v24, %v3175_v24 }
 0x184   :  { %2371 = vrsqrt.f32 %v1226_v63  ;;  %v3192_v60 = vmul.f32 0.015625, %v536_v48  ;;  %601 = vadd.xlane.f32.xlu0 %v3182_v23  ;;  %v1039_v14 = vsub.f32 %v911_v15, %v975_v44  ;;  %v1164_v63 = vsub.f32 %v2764_v43, %v3145_v57 }
 0x185   :  { %v532_v53 = vpop.xlane.xlu0 %531  ;;  %v753_v48 = vmul.f32 %v3182_v23, %v3182_v23 }
 0x186   :  { %603 = vadd.xlane.f32.xlu1 %v3190_v59  ;;  %v1103_v4 = vmax.f32 %v1039_v14, 0.0  ;;  %v3200_v34 = vmul.f32 0.015625, %v532_v53  ;;  %v976_v10 = vmul.f32 %v3192_v60, %v3192_v60  ;;  %v973_v14 = vmul.f32 %v3195_v5, %v3195_v5 }
 0x187   :  { %v792_v8 = vpop.xlane.xlu1 %791 }
 0x188   :  { %v2366_v6 = vpop.eup %2365  ;;  %v912_v12 = vmul.f32 0.015625, %v792_v8  ;;  %861 = vadd.xlane.f32.xlu0 %v755_v58  ;;  %v1231_v44 = vadd.f32 1e-05, %v1103_v4  ;;  %v1161_v8 = vsub.f32 %v2768_v45, %v3150_v19  ;;  %v974_v57 = vmul.f32 %v3200_v34, %v3200_v34 }
 0x189   :  { %v786_v15 = vpop.xlane.xlu0 %785  ;;  %v1355_v2 = vmul.f32 %v2366_v6, %v1163_v42  ;;  %v3226_v4 = vadd.f32 %v2992_v25, %v2758_v38  ;;  %v3231_v19 = vrot.slane %v2755_v37, %v1487_v18 }
 0x18a   :  { %v2368_v40 = vpop.eup %2367  ;;  %v1040_v53 = vsub.f32 %v912_v12, %v976_v10  ;;  %v909_v58 = vmul.f32 0.015625, %v786_v15  ;;  %863 = vadd.xlane.f32.xlu1 %v756_v1  ;;  %2373 = vrsqrt.f32 %v1231_v44  ;;  %v1162_v10 = vsub.f32 %v2772_v46, %v3155_v31 }
 0x18b   :  { %v1356_v43 = vmul.f32 %v2368_v40, %v1164_v63  ;;  %v788_v35 = vpop.xlane.xlu1 %787  ;;  %v1423_v44 = vmul.f32 %v3203_v20, %v1355_v2 }
 0x18c   :  { %v2370_v59 = vpop.eup %2369  ;;  %v1104_v6 = vmax.f32 %v1040_v53, 0.0  ;;  %v1037_v42 = vsub.f32 %v909_v58, %v973_v14  ;;  %v910_v23 = vmul.f32 0.015625, %v788_v35  ;;  %857 = vadd.xlane.f32.xlu0 %v753_v48  ;;  %v3237_v35 = vadd.f32 %v2999_v28, %v2758_v38 }
 0x18d   :  { %v542_v12 = vpop.xlane.xlu0 %541  ;;  %v1353_v45 = vmul.f32 %v2370_v59, %v1161_v8  ;;  %v1424_v1 = vmul.f32 %v3203_v20, %v1356_v43  ;;  %v1491_v58 = vadd.f32 %v3231_v19, %v1423_v44 }
 0x18e   :  { %v2372_v63 = vpop.eup %2371  ;;  %v1232_v25 = vadd.f32 1e-05, %v1104_v6  ;;  %v1101_v15 = vmax.f32 %v1037_v42, 0.0  ;;  %v1038_v40 = vsub.f32 %v910_v23, %v974_v57  ;;  %859 = vadd.xlane.f32.xlu1 %v754_v51  ;;  %v3244_v23 = vadd.f32 %v2997_v26, %v2758_v38 }
 0x18f   :  { %v544_v48 = vpop.xlane.xlu1 %543  ;;  %v1354_v46 = vmul.f32 %v2372_v63, %v1162_v10  ;;  %v1421_v31 = vmul.f32 %v3203_v20, %v1353_v45  ;;  %v1492_v18 = vadd.f32 %v3231_v19, %v1424_v1  ;;  %v3248_v53 = vmul.f32 0.015625, %v542_v12 }
 0x190   :  { %2375 = vrsqrt.f32 %v1232_v25  ;;  %v1229_v37 = vadd.f32 1e-05, %v1101_v15  ;;  %v1102_v59 = vmax.f32 %v1038_v40, 0.0  ;;  %613 = vadd.xlane.f32.xlu0 %v3226_v4  ;;  %v3255_v26 = vadd.f32 %v3003_v30, %v2758_v38 }
 0x191   :  { %v538_v51 = vpop.xlane.xlu0 %537  ;;  %v1422_v2 = vmul.f32 %v3203_v20, %v1354_v46  ;;  %v1489_v28 = vadd.f32 %v3231_v19, %v1421_v31  ;;  %v3257_v57 = vmul.f32 0.015625, %v544_v48  ;;  %v1556_v6 = vmax.f32 %v1492_v18, 0.0 }
 0x192   :  { %2377 = vrsqrt.f32 %v1229_v37  ;;  %v1230_v14 = vadd.f32 1e-05, %v1102_v59  ;;  %615 = vadd.xlane.f32.xlu1 %v3237_v35  ;;  %v759_v10 = vmul.f32 %v3226_v4, %v3226_v4  ;;  %v979_v63 = vmul.f32 %v3248_v53, %v3248_v53 }
 0x193   :  { %v540_v8 = vpop.xlane.xlu1 %539  ;;  %v1490_v43 = vadd.f32 %v3231_v19, %v1422_v2  ;;  %v1553_v12 = vmax.f32 %v1489_v28, 0.0  ;;  %v3264_v25 = vmul.f32 0.015625, %v538_v51  ;;  %v1555_v30 = vmax.f32 %v1491_v58, 0.0 }
 0x194   :  { %2379 = vrsqrt.f32 %v1230_v14  ;;  %609 = vadd.xlane.f32.xlu0 %v3244_v23  ;;  %v2374_v1 = vpop.eup %2373  ;;  %v1167_v40 = vsub.f32 %v2783_v54, %v3177_v61  ;;  %v3269_v44 = vmul.f32 0.015625, %v540_v8  ;;  %v760_v31 = vmul.f32 %v3237_v35, %v3237_v35 }
 0x195   :  { %v798_v42 = vpop.xlane.xlu0 %797  ;;  %v1554_v45 = vmax.f32 %v1490_v43, 0.0  ;;  %v980_v37 = vmul.f32 %v3257_v57, %v3257_v57  ;;  %v1618_v51 = vpack.c.bf16 %v1556_v6, %v1555_v30  ;;  %v1168_v2 = vsub.f32 %v2795_v62, %v3192_v60 }
 0x196   :  { %v915_v15 = vmul.f32 0.015625, %v798_v42  ;;  %611 = vadd.xlane.f32.xlu1 %v3255_v26  ;;  %v757_v54 = vmul.f32 %v3244_v23, %v3244_v23  ;;  %v758_v61 = vmul.f32 %v3255_v26, %v3255_v26  ;;  %v1359_v14 = vmul.f32 %v2374_v1, %v1167_v40 }
 0x197   :  { %v800_v48 = vpop.xlane.xlu1 %799  ;;  %v1617_v46 = vpack.c.bf16 %v1554_v45, %v1553_v12  ;;  %v977_v8 = vmul.f32 %v3264_v25, %v3264_v25  ;;  %v1165_v62 = vsub.f32 %v2786_v55, %v3195_v5  ;;  %v978_v60 = vmul.f32 %v3269_v44, %v3269_v44 }
 0x198   :  { %v1043_v59 = vsub.f32 %v915_v15, %v979_v63  ;;  %v916_v18 = vmul.f32 0.015625, %v800_v48  ;;  %869 = vadd.xlane.f32.xlu0 %v759_v10  ;;  %v3289_v6 = vadd.f32 %v3013_v47, %v2758_v38  ;;  %v1166_v48 = vsub.f32 %v2798_v0, %v3200_v34 }
 0x199   :  { %2275 = vmatprep.mubr.bf16.mxu0 %v1617_v46  ;;  %v794_v28 = vpop.xlane.xlu0 %793  ;;  %v1427_v5 = vmul.f32 %v3203_v20, %v1359_v14 }
 0x19a   :  { %v2376_v58 = vpop.eup %2375  ;;  %v1107_v43 = vmax.f32 %v1043_v59, 0.0  ;;  %v1044_v42 = vsub.f32 %v916_v18, %v980_v37  ;;  %v913_v10 = vmul.f32 0.015625, %v794_v28  ;;  %871 = vadd.xlane.f32.xlu1 %v760_v31  ;;  %2276 = vmatmul.mubr.bf16.vlgmr.msra.gmra.mrb[64].mxu0 %v1618_v51  ;;  %v3297_v51 = vadd.f32 %v3017_v52, %v2758_v38 }
 0x19b   :  { %v796_v12 = vpop.xlane.xlu1 %795  ;;  %v1360_v45 = vmul.f32 %v2376_v58, %v1168_v2  ;;  %v3304_v58 = vadd.f32 %v3015_v50, %v2758_v38  ;;  %v3315_v50 = vadd.f32 %v3024_v3, %v2758_v38 }
 0x19c   :  { %v2378_v1 = vpop.eup %2377  ;;  %v1235_v63 = vadd.f32 1e-05, %v1107_v43  ;;  %v1108_v15 = vmax.f32 %v1044_v42, 0.0  ;;  %v1041_v30 = vsub.f32 %v913_v10, %v977_v8  ;;  %v914_v40 = vmul.f32 0.015625, %v796_v12  ;;  %865 = vadd.xlane.f32.xlu0 %v757_v54 }
 0x19d   :  { %v550_v46 = vpop.xlane.xlu0 %549  ;;  %v1357_v55 = vmul.f32 %v2378_v1, %v1165_v62  ;;  %v1428_v31 = vmul.f32 %v3203_v20, %v1360_v45  ;;  %v1495_v10 = vadd.f32 %v3231_v19, %v1427_v5 }
 0x19e   :  { %v2380_v37 = vpop.eup %2379  ;;  %2381 = vrsqrt.f32 %v1235_v63  ;;  %v1236_v47 = vadd.f32 1e-05, %v1108_v15  ;;  %v1105_v59 = vmax.f32 %v1041_v30, 0.0  ;;  %v1042_v18 = vsub.f32 %v914_v40, %v978_v60  ;;  %867 = vadd.xlane.f32.xlu1 %v758_v61 }
 0x19f   :  { %v552_v2 = vpop.xlane.xlu1 %551  ;;  %v1358_v28 = vmul.f32 %v2380_v37, %v1166_v48  ;;  %v1425_v0 = vmul.f32 %v3203_v20, %v1357_v55  ;;  %v1496_v14 = vadd.f32 %v3231_v19, %v1428_v31  ;;  %v3308_v42 = vmul.f32 0.015625, %v550_v46 }
 0x1a0   :  { %2383 = vrsqrt.f32 %v1236_v47  ;;  %v1233_v34 = vadd.f32 1e-05, %v1105_v59  ;;  %v1106_v54 = vmax.f32 %v1042_v18, 0.0  ;;  %621 = vadd.xlane.f32.xlu0 %v3289_v6  ;;  %v3317_v12 = vmul.f32 0.015625, %v552_v2 }
 0x1a1   :  { %v546_v61 = vpop.xlane.xlu0 %545  ;;  %v1426_v8 = vmul.f32 %v3203_v20, %v1358_v28  ;;  %v1493_v52 = vadd.f32 %v3231_v19, %v1425_v0  ;;  %v1560_v45 = vmax.f32 %v1496_v14, 0.0  ;;  %v763_v63 = vmul.f32 %v3289_v6, %v3289_v6 }
 0x1a2   :  { %2385 = vrsqrt.f32 %v1233_v34  ;;  %v1234_v43 = vadd.f32 1e-05, %v1106_v54  ;;  %623 = vadd.xlane.f32.xlu1 %v3297_v51  ;;  %v983_v40 = vmul.f32 %v3308_v42, %v3308_v42  ;;  %v3324_v48 = vmul.f32 0.015625, %v546_v61 }
 0x1a3   :  { %v548_v62 = vpop.xlane.xlu1 %547  ;;  %v1494_v60 = vadd.f32 %v3231_v19, %v1426_v8  ;;  %v1557_v15 = vmax.f32 %v1493_v52, 0.0  ;;  %v1559_v3 = vmax.f32 %v1495_v10, 0.0  ;;  %v1171_v55 = vsub.f32 %v2816_v7, %v3248_v53 }
 0x1a4   :  { %2387 = vrsqrt.f32 %v1234_v43  ;;  %617 = vadd.xlane.f32.xlu0 %v3304_v58  ;;  %v3329_v5 = vmul.f32 0.015625, %v548_v62  ;;  %v764_v47 = vmul.f32 %v3297_v51, %v3297_v51  ;;  %v984_v18 = vmul.f32 %v3317_v12, %v3317_v12 }
 0x1a5   :  { %v806_v1 = vpop.xlane.xlu0 %805  ;;  %v1558_v30 = vmax.f32 %v1494_v60, 0.0  ;;  %v1620_v0 = vpack.c.bf16 %v1560_v45, %v1559_v3  ;;  %v1172_v34 = vsub.f32 %v2830_v13, %v3257_v57  ;;  %v761_v53 = vmul.f32 %v3304_v58, %v3304_v58 }
 0x1a6   :  { %v919_v46 = vmul.f32 0.015625, %v806_v1  ;;  %619 = vadd.xlane.f32.xlu1 %v3315_v50  ;;  %v762_v54 = vmul.f32 %v3315_v50, %v3315_v50  ;;  %v981_v8 = vmul.f32 %v3324_v48, %v3324_v48  ;;  %v1169_v13 = vsub.f32 %v2839_v16, %v3264_v25 }
 0x1a7   :  { %v808_v31 = vpop.xlane.xlu1 %807  ;;  %v1619_v37 = vpack.c.bf16 %v1558_v30, %v1557_v15  ;;  %v982_v57 = vmul.f32 %v3329_v5, %v3329_v5  ;;  %v3349_v62 = vadd.f32 %v3036_v9, %v2758_v38 }
 0x1a8   :  { %v2382_v59 = vpop.eup %2381  ;;  %v1047_v2 = vsub.f32 %v919_v46, %v983_v40  ;;  %v920_v28 = vmul.f32 0.015625, %v808_v31  ;;  %877 = vadd.xlane.f32.xlu0 %v763_v63  ;;  %v1170_v46 = vsub.f32 %v2843_v17, %v3269_v44 }
 0x1a9   :  { %2279 = vmatprep.mubr.bf16.mxu1 %v1619_v37  ;;  %v802_v7 = vpop.xlane.xlu0 %801  ;;  %v1363_v14 = vmul.f32 %v2382_v59, %v1171_v55  ;;  %v3357_v59 = vadd.f32 %v3043_v22, %v2758_v38 }
 0x1aa   :  { %v2384_v61 = vpop.eup %2383  ;;  %v1111_v52 = vmax.f32 %v1047_v2, 0.0  ;;  %v1048_v43 = vsub.f32 %v920_v28, %v984_v18  ;;  %v917_v10 = vmul.f32 0.015625, %v802_v7  ;;  %879 = vadd.xlane.f32.xlu1 %v764_v47  ;;  %2280 = vmatmul.mubr.bf16.vlgmr.msra.gmra.mrb[0].mxu1 %v1620_v0 }
 0x1ab   :  { %v804_v60 = vpop.xlane.xlu1 %803  ;;  %v1364_v45 = vmul.f32 %v2384_v61, %v1172_v34  ;;  %v1431_v25 = vmul.f32 %v3203_v20, %v1363_v14  ;;  %v3364_v34 = vadd.f32 %v3041_v11, %v2758_v38  ;;  %v3375_v11 = vadd.f32 %v3047_v21, %v2758_v38 }
 0x1ac   :  { %v2386_v1 = vpop.eup %2385  ;;  %v1239_v63 = vadd.f32 1e-05, %v1111_v52  ;;  %v1112_v15 = vmax.f32 %v1048_v43, 0.0  ;;  %v1045_v30 = vsub.f32 %v917_v10, %v981_v8  ;;  %v918_v40 = vmul.f32 0.015625, %v804_v60  ;;  %873 = vadd.xlane.f32.xlu0 %v761_v53 }
 0x1ad   :  { %v558_v3 = vpop.xlane.xlu0 %557  ;;  %v1361_v16 = vmul.f32 %v2386_v1, %v1169_v13  ;;  %v1432_v55 = vmul.f32 %v3203_v20, %v1364_v45  ;;  %v1499_v61 = vadd.f32 %v3231_v19, %v1431_v25 }
 0x1ae   :  { %v2388_v31 = vpop.eup %2387  ;;  %2389 = vrsqrt.f32 %v1239_v63  ;;  %v1240_v9 = vadd.f32 1e-05, %v1112_v15  ;;  %v1109_v37 = vmax.f32 %v1045_v30, 0.0  ;;  %v1046_v47 = vsub.f32 %v918_v40, %v982_v57  ;;  %875 = vadd.xlane.f32.xlu1 %v762_v54 }
 0x1af   :  { %v560_v18 = vpop.xlane.xlu1 %559  ;;  %v1362_v2 = vmul.f32 %v2388_v31, %v1170_v46  ;;  %v1429_v17 = vmul.f32 %v3203_v20, %v1361_v16  ;;  %v1500_v0 = vadd.f32 %v3231_v19, %v1432_v55  ;;  %v3368_v14 = vmul.f32 0.015625, %v558_v3 }
 0x1b0   :  { %2391 = vrsqrt.f32 %v1240_v9  ;;  %v1237_v44 = vadd.f32 1e-05, %v1109_v37  ;;  %v1110_v28 = vmax.f32 %v1046_v47, 0.0  ;;  %629 = vadd.xlane.f32.xlu0 %v3349_v62  ;;  %v3377_v43 = vmul.f32 0.015625, %v560_v18 }
 0x1b1   :  { %v554_v7 = vpop.xlane.xlu0 %553  ;;  %v1430_v53 = vmul.f32 %v3203_v20, %v1362_v2  ;;  %v1497_v22 = vadd.f32 %v3231_v19, %v1429_v17  ;;  %v1564_v10 = vmax.f32 %v1500_v0, 0.0  ;;  %v767_v57 = vmul.f32 %v3349_v62, %v3349_v62 }
 0x1b2   :  { %2393 = vrsqrt.f32 %v1237_v44  ;;  %v1238_v54 = vadd.f32 1e-05, %v1110_v28  ;;  %631 = vadd.xlane.f32.xlu1 %v3357_v59  ;;  %v987_v1 = vmul.f32 %v3368_v14, %v3368_v14  ;;  %v3384_v63 = vmul.f32 0.015625, %v554_v7 }
 0x1b3   :  { %v556_v8 = vpop.xlane.xlu1 %555  ;;  %v1498_v52 = vadd.f32 %v3231_v19, %v1430_v53  ;;  %v1561_v60 = vmax.f32 %v1497_v22, 0.0  ;;  %v1563_v21 = vmax.f32 %v1499_v61, 0.0  ;;  %v1175_v30 = vsub.f32 %v2868_v27, %v3308_v42 }
 0x1b4   :  { %2395 = vrsqrt.f32 %v1238_v54  ;;  %625 = vadd.xlane.f32.xlu0 %v3364_v34  ;;  %v3389_v40 = vmul.f32 0.015625, %v556_v8  ;;  %v768_v16 = vmul.f32 %v3357_v59, %v3357_v59  ;;  %v988_v55 = vmul.f32 %v3377_v43, %v3377_v43 }
 0x1b5   :  { %v814_v13 = vpop.xlane.xlu0 %813  ;;  %v1562_v45 = vmax.f32 %v1498_v52, 0.0  ;;  %v1622_v37 = vpack.c.bf16 %v1564_v10, %v1563_v21  ;;  %v1176_v47 = vsub.f32 %v2883_v33, %v3317_v12  ;;  %v765_v42 = vmul.f32 %v3364_v34, %v3364_v34 }
 0x1b6   :  { %v923_v15 = vmul.f32 0.015625, %v814_v13  ;;  %627 = vadd.xlane.f32.xlu1 %v3375_v11  ;;  %v766_v18 = vmul.f32 %v3375_v11, %v3375_v11  ;;  %v985_v44 = vmul.f32 %v3384_v63, %v3384_v63  ;;  %v1173_v33 = vsub.f32 %v2893_v39, %v3324_v48 }
 0x1b7   :  { %v816_v46 = vpop.xlane.xlu1 %815  ;;  %v1621_v3 = vpack.c.bf16 %v1562_v45, %v1561_v60  ;;  %v986_v12 = vmul.f32 %v3389_v40, %v3389_v40  ;;  %v3409_v53 = vadd.f32 %v3057_v36, %v2758_v38 }
 0x1b8   :  { %v2390_v25 = vpop.eup %2389  ;;  %v1051_v31 = vsub.f32 %v923_v15, %v987_v1  ;;  %v924_v9 = vmul.f32 0.015625, %v816_v46  ;;  %885 = vadd.xlane.f32.xlu0 %v767_v57  ;;  %v1174_v57 = vsub.f32 %v2898_v41, %v3329_v5 }
 0x1b9   :  { %2283 = vmatprep.mubr.bf16.mxu1 %v1621_v3  ;;  %v810_v27 = vpop.xlane.xlu0 %809  ;;  %v1367_v2 = vmul.f32 %v2390_v25, %v1175_v30  ;;  %v3417_v30 = vadd.f32 %v3061_v56, %v2758_v38 }
 0x1ba   :  { %v2392_v17 = vpop.eup %2391  ;;  %v1115_v28 = vmax.f32 %v1051_v31, 0.0  ;;  %v1052_v0 = vsub.f32 %v924_v9, %v988_v55  ;;  %v921_v7 = vmul.f32 0.015625, %v810_v27  ;;  %887 = vadd.xlane.f32.xlu1 %v768_v16  ;;  %2284 = vmatmul.mubr.bf16.gmra.mrb[4].mxu1 %v1622_v37  ;;  %v3424_v55 = vadd.f32 %v3059_v32, %v2758_v38 }
 0x1bb   :  { %v812_v22 = vpop.xlane.xlu1 %811  ;;  %v1368_v54 = vmul.f32 %v2392_v17, %v1176_v47  ;;  %v1435_v48 = vmul.f32 %v3203_v20, %v1367_v2  ;;  %v3435_v32 = vadd.f32 %v3068_v29, %v2758_v38 }
 0x1bc   :  { %v2394_v61 = vpop.eup %2393  ;;  %v1243_v8 = vadd.f32 1e-05, %v1115_v28  ;;  %v1116_v52 = vmax.f32 %v1052_v0, 0.0  ;;  %v1049_v10 = vsub.f32 %v921_v7, %v985_v44  ;;  %v922_v13 = vmul.f32 0.015625, %v812_v22  ;;  %881 = vadd.xlane.f32.xlu0 %v765_v42 }
 0x1bd   :  { %v566_v60 = vpop.xlane.xlu0 %565  ;;  %v1365_v39 = vmul.f32 %v2394_v61, %v1173_v33  ;;  %v1436_v45 = vmul.f32 %v3203_v20, %v1368_v54  ;;  %v1503_v27 = vadd.f32 %v3231_v19, %v1435_v48  ;;  %v771_v28 = vmul.f32 %v3409_v53, %v3409_v53  ;;  %v4230_v54 = vld [vmem:[#allocation3_spill] sm:$0xff] }
 0x1be   :  { %v2396_v1 = vpop.eup %2395  ;;  %2397 = vrsqrt.f32 %v1243_v8  ;;  %v1244_v36 = vadd.f32 1e-05, %v1116_v52  ;;  %v1113_v15 = vmax.f32 %v1049_v10, 0.0  ;;  %v1050_v21 = vsub.f32 %v922_v13, %v986_v12  ;;  %883 = vadd.xlane.f32.xlu1 %v766_v18 }
 0x1bf   :  { %v568_v46 = vpop.xlane.xlu1 %567  ;;  %v1366_v3 = vmul.f32 %v2396_v1, %v1174_v57  ;;  %v1433_v41 = vmul.f32 %v3203_v20, %v1365_v39  ;;  %v1504_v25 = vadd.f32 %v3231_v19, %v1436_v45  ;;  %v3428_v47 = vmul.f32 0.015625, %v566_v60  ;;  %v4231_v1 = vld [vmem:[#allocation4_spill] sm:$0xff] }
 0x1c0   :  { %2399 = vrsqrt.f32 %v1244_v36  ;;  %v1241_v5 = vadd.f32 1e-05, %v1113_v15  ;;  %v1114_v16 = vmax.f32 %v1050_v21, 0.0  ;;  %637 = vadd.xlane.f32.xlu0 %v3409_v53  ;;  %v3437_v2 = vmul.f32 0.015625, %v568_v46 }
 0x1c1   :  { %v562_v31 = vpop.xlane.xlu0 %561  ;;  %v1434_v9 = vmul.f32 %v3203_v20, %v1366_v3  ;;  %v1501_v56 = vadd.f32 %v3231_v19, %v1433_v41  ;;  %v1568_v17 = vmax.f32 %v1504_v25, 0.0  ;;  %v991_v33 = vmul.f32 %v3428_v47, %v3428_v47 }
 0x1c2   :  { %2401 = vrsqrt.f32 %v1241_v5  ;;  %v1242_v37 = vadd.f32 1e-05, %v1114_v16  ;;  %639 = vadd.xlane.f32.xlu1 %v3417_v30  ;;  %v3444_v12 = vmul.f32 0.015625, %v562_v31  ;;  %v1567_v29 = vmax.f32 %v1503_v27, 0.0 }
 0x1c3   :  { %v564_v42 = vpop.xlane.xlu1 %563  ;;  %v1502_v18 = vadd.f32 %v3231_v19, %v1434_v9  ;;  %v1565_v0 = vmax.f32 %v1501_v56, 0.0  ;;  %v1179_v61 = vsub.f32 %v4230_v54, %v3368_v14  ;;  %v772_v13 = vmul.f32 %v3417_v30, %v3417_v30  ;;  %v4233_v56 = vld [vmem:[#allocation19_spill] sm:$0xff] }
 0x1c4   :  { %2403 = vrsqrt.f32 %v1242_v37  ;;  %633 = vadd.xlane.f32.xlu0 %v3424_v55  ;;  %v3449_v8 = vmul.f32 0.015625, %v564_v42  ;;  %v992_v60 = vmul.f32 %v3437_v2, %v3437_v2  ;;  %v1624_v45 = vpack.c.bf16 %v1568_v17, %v1567_v29 }
 0x1c5   :  { %v822_v44 = vpop.xlane.xlu0 %821  ;;  %v1566_v7 = vmax.f32 %v1502_v18, 0.0  ;;  %v1180_v36 = vsub.f32 %v4231_v1, %v3377_v43  ;;  %v769_v15 = vmul.f32 %v3424_v55, %v3424_v55  ;;  %v770_v21 = vmul.f32 %v3435_v32, %v3435_v32  ;;  %v4232_v43 = vld [vmem:[#allocation5_spill] sm:$0xff] }
 0x1c6   :  { %v927_v22 = vmul.f32 0.015625, %v822_v44  ;;  %635 = vadd.xlane.f32.xlu1 %v3435_v32  ;;  %v989_v41 = vmul.f32 %v3444_v12, %v3444_v12  ;;  %v1177_v31 = vsub.f32 %v4232_v43, %v3384_v63  ;;  %v990_v9 = vmul.f32 %v3449_v8, %v3449_v8 }
 0x1c7   :  { %v824_v52 = vpop.xlane.xlu1 %823  ;;  %v1623_v10 = vpack.c.bf16 %v1566_v7, %v1565_v0  ;;  %v3469_v37 = vadd.f32 %v4233_v56, %v2758_v38  ;;  %v4234_v7 = vld [vmem:[#allocation6_spill] sm:$0xff] }
 0x1c8   :  { %v2398_v57 = vpop.eup %2397  ;;  %v1055_v39 = vsub.f32 %v927_v22, %v991_v33  ;;  %v928_v48 = vmul.f32 0.015625, %v824_v52  ;;  %893 = vadd.xlane.f32.xlu0 %v771_v28  ;;  %v1178_v33 = vsub.f32 %v4234_v7, %v3389_v40 }
 0x1c9   :  { %2287 = vmatprep.mubr.bf16.mxu1 %v1623_v10  ;;  %v818_v14 = vpop.xlane.xlu0 %817  ;;  %v1371_v46 = vmul.f32 %v2398_v57, %v1179_v61  ;;  %v4235_v57 = vld [vmem:[#allocation21_spill] sm:$0xff] }
 0x1ca   :  { %v2400_v3 = vpop.eup %2399  ;;  %v1119_v5 = vmax.f32 %v1055_v39, 0.0  ;;  %v1056_v16 = vsub.f32 %v928_v48, %v992_v60  ;;  %v925_v25 = vmul.f32 0.015625, %v818_v14  ;;  %895 = vadd.xlane.f32.xlu1 %v772_v13  ;;  %2288 = vmatmul.mubr.bf16.gmra.mrb[8].mxu1 %v1624_v45  ;;  %v3477_v60 = vadd.f32 %v4235_v57, %v2758_v38  ;;  %v4236_v14 = vld [vmem:[#allocation20_spill] sm:$0xff] }
 0x1cb   :  { %v820_v27 = vpop.xlane.xlu1 %819  ;;  %v1372_v42 = vmul.f32 %v2400_v3, %v1180_v36  ;;  %v1439_v29 = vmul.f32 %v3203_v20, %v1371_v46 }
 0x1cc   :  { %v2402_v18 = vpop.eup %2401  ;;  %v1247_v17 = vadd.f32 1e-05, %v1119_v5  ;;  %v1120_v44 = vmax.f32 %v1056_v16, 0.0  ;;  %v1053_v28 = vsub.f32 %v925_v25, %v989_v41  ;;  %v926_v0 = vmul.f32 0.015625, %v820_v27  ;;  %889 = vadd.xlane.f32.xlu0 %v769_v15  ;;  %v4237_v25 = vld [vmem:[#allocation22_spill] sm:$0xff] }
 0x1cd   :  { %v574_v22 = vpop.xlane.xlu0 %573  ;;  %v1369_v63 = vmul.f32 %v2402_v18, %v1177_v31  ;;  %v1440_v54 = vmul.f32 %v3203_v20, %v1372_v42  ;;  %v3484_v15 = vadd.f32 %v4236_v14, %v2758_v38  ;;  %v1507_v16 = vadd.f32 %v3231_v19, %v1439_v29 }
 0x1ce   :  { %v2404_v61 = vpop.eup %2403  ;;  %2405 = vrsqrt.f32 %v1247_v17  ;;  %v1248_v52 = vadd.f32 1e-05, %v1120_v44  ;;  %v1117_v10 = vmax.f32 %v1053_v28, 0.0  ;;  %v1054_v13 = vsub.f32 %v926_v0, %v990_v9  ;;  %891 = vadd.xlane.f32.xlu1 %v770_v21 }
 0x1cf   :  { %v576_v39 = vpop.xlane.xlu1 %575  ;;  %v1370_v48 = vmul.f32 %v2404_v61, %v1178_v33  ;;  %v1437_v40 = vmul.f32 %v3203_v20, %v1369_v63  ;;  %v1508_v36 = vadd.f32 %v3231_v19, %v1440_v54  ;;  %v3488_v5 = vmul.f32 0.015625, %v574_v22  ;;  %v4238_v33 = vld [vmem:[#allocation7_spill] sm:$0xff] }
 0x1d0   :  { %2407 = vrsqrt.f32 %v1248_v52  ;;  %v1245_v45 = vadd.f32 1e-05, %v1117_v10  ;;  %v1118_v1 = vmax.f32 %v1054_v13, 0.0  ;;  %645 = vadd.xlane.f32.xlu0 %v3469_v37  ;;  %v3494_v43 = vadd.f32 %v4237_v25, %v2758_v38 }
 0x1d1   :  { %v570_v21 = vpop.xlane.xlu0 %569  ;;  %v1438_v46 = vmul.f32 %v3203_v20, %v1370_v48  ;;  %v1505_v3 = vadd.f32 %v3231_v19, %v1437_v40  ;;  %v3497_v56 = vmul.f32 0.015625, %v576_v39  ;;  %v1572_v27 = vmax.f32 %v1508_v36, 0.0  ;;  %v4239_v48 = vld [vmem:[#allocation8_spill] sm:$0xff] }
 0x1d2   :  { %2409 = vrsqrt.f32 %v1245_v45  ;;  %v1246_v41 = vadd.f32 1e-05, %v1118_v1  ;;  %647 = vadd.xlane.f32.xlu1 %v3477_v60  ;;  %v773_v18 = vmul.f32 %v3484_v15, %v3484_v15  ;;  %v995_v28 = vmul.f32 %v3488_v5, %v3488_v5 }
 0x1d3   :  { %v572_v31 = vpop.xlane.xlu1 %571  ;;  %v1506_v9 = vadd.f32 %v3231_v19, %v1438_v46  ;;  %v1569_v17 = vmax.f32 %v1505_v3, 0.0  ;;  %v3504_v38 = vmul.f32 0.015625, %v570_v21  ;;  %v1571_v7 = vmax.f32 %v1507_v16, 0.0 }
 0x1d4   :  { %2411 = vrsqrt.f32 %v1246_v41  ;;  %641 = vadd.xlane.f32.xlu0 %v3484_v15  ;;  %v1183_v22 = vsub.f32 %v4238_v33, %v3428_v47  ;;  %v3509_v63 = vmul.f32 0.015625, %v572_v31  ;;  %v774_v61 = vmul.f32 %v3494_v43, %v3494_v43  ;;  %v4240_v41 = vld [vmem:[#allocation9_spill] sm:$0xff] }
 0x1d5   :  { %v830_v42 = vpop.xlane.xlu0 %829  ;;  %v1570_v44 = vmax.f32 %v1506_v9, 0.0  ;;  %v996_v10 = vmul.f32 %v3497_v56, %v3497_v56  ;;  %v1626_v39 = vpack.c.bf16 %v1572_v27, %v1571_v7  ;;  %v1184_v40 = vsub.f32 %v4239_v48, %v3437_v2 }
 0x1d6   :  { %v931_v0 = vmul.f32 0.015625, %v830_v42  ;;  %643 = vadd.xlane.f32.xlu1 %v3494_v43  ;;  %v775_v45 = vmul.f32 %v3469_v37, %v3469_v37  ;;  %v993_v14 = vmul.f32 %v3504_v38, %v3504_v38  ;;  %v1181_v16 = vsub.f32 %v4240_v41, %v3444_v12 }
 0x1d7   :  { %v832_v29 = vpop.xlane.xlu1 %831  ;;  %v1625_v54 = vpack.c.bf16 %v1570_v44, %v1569_v17  ;;  %v994_v2 = vmul.f32 %v3509_v63, %v3509_v63  ;;  %v776_v31 = vmul.f32 %v3477_v60, %v3477_v60 }
 0x1d8   :  { %v2406_v52 = vpop.eup %2405  ;;  %v1059_v13 = vsub.f32 %v931_v0, %v995_v28  ;;  %v932_v57 = vmul.f32 0.015625, %v832_v29  ;;  %897 = vadd.xlane.f32.xlu0 %v773_v18  ;;  %v4241_v28 = vld [vmem:[#allocation10_spill] sm:$0xff] }
 0x1d9   :  { %2291 = vmatprep.mubr.bf16.mxu1 %v1625_v54  ;;  %v826_v47 = vpop.xlane.xlu0 %825  ;;  %v1375_v1 = vmul.f32 %v2406_v52, %v1183_v22  ;;  %v1182_v0 = vsub.f32 %v4241_v28, %v3449_v8 }
 0x1da   :  { %v2408_v36 = vpop.eup %2407  ;;  %v1123_v21 = vmax.f32 %v1059_v13, 0.0  ;;  %v1060_v46 = vsub.f32 %v932_v57, %v996_v10  ;;  %v929_v3 = vmul.f32 0.015625, %v826_v47  ;;  %899 = vadd.xlane.f32.xlu1 %v774_v61  ;;  %2292 = vmatmul.mubr.bf16.gmra.mrb[12].mxu1 %v1626_v39 }
 0x1db   :  { %v828_v25 = vpop.xlane.xlu1 %827  ;;  %v1376_v9 = vmul.f32 %v2408_v36, %v1184_v40  ;;  %v1443_v12 = vmul.f32 %v3203_v20, %v1375_v1 }
 0x1dc   :  { %v2410_v27 = vpop.eup %2409  ;;  %v1251_v42 = vadd.f32 1e-05, %v1123_v21  ;;  %v1124_v18 = vmax.f32 %v1060_v46, 0.0  ;;  %v1057_v17 = vsub.f32 %v929_v3, %v993_v14  ;;  %v930_v44 = vmul.f32 0.015625, %v828_v25  ;;  %901 = vadd.xlane.f32.xlu0 %v775_v45 }
 0x1dd   :  { %v582_v7 = vpop.xlane.xlu0 %581  ;;  %v1373_v33 = vmul.f32 %v2410_v27, %v1181_v16  ;;  %v1444_v22 = vmul.f32 %v3203_v20, %v1376_v9  ;;  %v1511_v14 = vadd.f32 %v3231_v19, %v1443_v12 }
 0x1de   :  { %v2412_v29 = vpop.eup %2411  ;;  %2413 = vrsqrt.f32 %v1251_v42  ;;  %v1252_v54 = vadd.f32 1e-05, %v1124_v18  ;;  %v1121_v61 = vmax.f32 %v1057_v17, 0.0  ;;  %v1058_v52 = vsub.f32 %v930_v44, %v994_v2  ;;  %903 = vadd.xlane.f32.xlu1 %v776_v31  ;;  %v4242_v18 = vld [vmem:[#allocation11_spill] sm:$0xff] }
 0x1df   :  { %v584_v10 = vpop.xlane.xlu1 %583  ;;  %v1374_v13 = vmul.f32 %v2412_v29, %v1182_v0  ;;  %v1441_v57 = vmul.f32 %v3203_v20, %v1373_v33  ;;  %v1512_v8 = vadd.f32 %v3231_v19, %v1444_v22  ;;  %v3535_v36 = vmul.f32 0.015625, %v582_v7 }
 0x1e0   :  { %2415 = vrsqrt.f32 %v1252_v54  ;;  %v1249_v39 = vadd.f32 1e-05, %v1121_v61  ;;  %v1122_v48 = vmax.f32 %v1058_v52, 0.0  ;;  %v3539_v3 = vmul.f32 0.015625, %v584_v10  ;;  %v4243_v54 = vld [vmem:[#allocation12_spill] sm:$0xff] }
 0x1e1   :  { %v578_v40 = vpop.xlane.xlu0 %577  ;;  %v1442_v47 = vmul.f32 %v3203_v20, %v1374_v13  ;;  %v1509_v45 = vadd.f32 %v3231_v19, %v1441_v57  ;;  %v1576_v41 = vmax.f32 %v1512_v8, 0.0  ;;  %v999_v31 = vmul.f32 %v3535_v36, %v3535_v36  ;;  %v4244_v8 = vld [vmem:[#allocation13_spill] sm:$0xff] }
 0x1e2   :  { %2417 = vrsqrt.f32 %v1249_v39  ;;  %v1250_v1 = vadd.f32 1e-05, %v1122_v48  ;;  %v3543_v9 = vmul.f32 0.015625, %v578_v40  ;;  %v1575_v42 = vmax.f32 %v1511_v14, 0.0 }
 0x1e3   :  { %v580_v21 = vpop.xlane.xlu1 %579  ;;  %v1510_v46 = vadd.f32 %v3231_v19, %v1442_v47  ;;  %v1573_v2 = vmax.f32 %v1509_v45, 0.0  ;;  %v1187_v17 = vsub.f32 %v4242_v18, %v3488_v5  ;;  %v1000_v33 = vmul.f32 %v3539_v3, %v3539_v3 }
 0x1e4   :  { %2419 = vrsqrt.f32 %v1250_v1  ;;  %v3547_v44 = vmul.f32 0.015625, %v580_v21  ;;  %v1628_v29 = vpack.c.bf16 %v1576_v41, %v1575_v42  ;;  %v1188_v61 = vsub.f32 %v4243_v54, %v3497_v56 }
 0x1e5   :  { %v838_v16 = vpop.xlane.xlu0 %837  ;;  %v1574_v25 = vmax.f32 %v1510_v46, 0.0  ;;  %v997_v5 = vmul.f32 %v3543_v9, %v3543_v9  ;;  %v1185_v40 = vsub.f32 %v4244_v8, %v3504_v38 }
 0x1e6   :  { %v935_v27 = vmul.f32 0.015625, %v838_v16  ;;  %v998_v47 = vmul.f32 %v3547_v44, %v3547_v44  ;;  %v4245_v16 = vld [vmem:[#allocation14_spill] sm:$0xff] }
 0x1e7   :  { %v840_v28 = vpop.xlane.xlu1 %839  ;;  %v1627_v0 = vpack.c.bf16 %v1574_v25, %v1573_v2  ;;  %v1186_v2 = vsub.f32 %v4245_v16, %v3509_v63 }
 0x1e8   :  { %v2414_v7 = vpop.eup %2413  ;;  %v1063_v12 = vsub.f32 %v935_v27, %v999_v31  ;;  %v936_v22 = vmul.f32 0.015625, %v840_v28 }
 0x1e9   :  { %2295 = vmatprep.mubr.bf16.mxu1 %v1627_v0  ;;  %v834_v52 = vpop.xlane.xlu0 %833  ;;  %v1379_v10 = vmul.f32 %v2414_v7, %v1187_v17 }
 0x1ea   :  { %v2416_v13 = vpop.eup %2415  ;;  %v1127_v57 = vmax.f32 %v1063_v12, 0.0  ;;  %v1064_v39 = vsub.f32 %v936_v22, %v1000_v33  ;;  %v933_v48 = vmul.f32 0.015625, %v834_v52  ;;  %2296 = vmatmul.mubr.bf16.gmra.mrb[16].mxu1 %v1628_v29 }
 0x1eb   :  { %v836_v45 = vpop.xlane.xlu1 %835  ;;  %v1380_v1 = vmul.f32 %v2416_v13, %v1188_v61  ;;  %v1447_v27 = vmul.f32 %v3203_v20, %v1379_v10 }
 0x1ec   :  { %v2418_v56 = vpop.eup %2417  ;;  %v1255_v14 = vadd.f32 1e-05, %v1127_v57  ;;  %v1128_v21 = vmax.f32 %v1064_v39, 0.0  ;;  %v1061_v46 = vsub.f32 %v933_v48, %v997_v5  ;;  %v934_v41 = vmul.f32 0.015625, %v836_v45 }
 0x1ed   :  { %v590_v25 = vpop.xlane.xlu0 %589  ;;  %v1377_v31 = vmul.f32 %v2418_v56, %v1185_v40  ;;  %v1448_v42 = vmul.f32 %v3203_v20, %v1380_v1  ;;  %v1515_v13 = vadd.f32 %v3231_v19, %v1447_v27 }
 0x1ee   :  { %v2420_v38 = vpop.eup %2419  ;;  %2421 = vrsqrt.f32 %v1255_v14  ;;  %v1256_v18 = vadd.f32 1e-05, %v1128_v21  ;;  %v1125_v17 = vmax.f32 %v1061_v46, 0.0  ;;  %v1062_v28 = vsub.f32 %v934_v41, %v998_v47  ;;  %v4246_v21 = vld [vmem:[#allocation15_spill] sm:$0xff] }
 0x1ef   :  { %v592_v0 = vpop.xlane.xlu1 %591  ;;  %v1378_v7 = vmul.f32 %v2420_v38, %v1186_v2  ;;  %v1445_v33 = vmul.f32 %v3203_v20, %v1377_v31  ;;  %v1516_v63 = vadd.f32 %v3231_v19, %v1448_v42  ;;  %v3567_v10 = vmul.f32 0.015625, %v590_v25 }
 0x1f0   :  { %2423 = vrsqrt.f32 %v1256_v18  ;;  %v1253_v12 = vadd.f32 1e-05, %v1125_v17  ;;  %v1126_v22 = vmax.f32 %v1062_v28, 0.0  ;;  %v3571_v39 = vmul.f32 0.015625, %v592_v0  ;;  %v4247_v18 = vld [vmem:[#allocation16_spill] sm:$0xff] }
 0x1f1   :  { %v586_v29 = vpop.xlane.xlu0 %585  ;;  %v1446_v54 = vmul.f32 %v3203_v20, %v1378_v7  ;;  %v1513_v61 = vadd.f32 %v3231_v19, %v1445_v33  ;;  %v1580_v48 = vmax.f32 %v1516_v63, 0.0  ;;  %v1003_v45 = vmul.f32 %v3567_v10, %v3567_v10  ;;  %v4248_v63 = vld [vmem:[#allocation17_spill] sm:$0xff] }
 0x1f2   :  { %2425 = vrsqrt.f32 %v1253_v12  ;;  %v1254_v52 = vadd.f32 1e-05, %v1126_v22  ;;  %v3575_v1 = vmul.f32 0.015625, %v586_v29  ;;  %v1579_v14 = vmax.f32 %v1515_v13, 0.0 }
 0x1f3   :  { %v588_v5 = vpop.xlane.xlu1 %587  ;;  %v1514_v57 = vadd.f32 %v3231_v19, %v1446_v54  ;;  %v1577_v40 = vmax.f32 %v1513_v61, 0.0  ;;  %v1191_v46 = vsub.f32 %v4246_v21, %v3535_v36  ;;  %v1004_v31 = vmul.f32 %v3571_v39, %v3571_v39 }
 0x1f4   :  { %2427 = vrsqrt.f32 %v1254_v52  ;;  %v3579_v41 = vmul.f32 0.015625, %v588_v5  ;;  %v1630_v38 = vpack.c.bf16 %v1580_v48, %v1579_v14  ;;  %v1192_v17 = vsub.f32 %v4247_v18, %v3539_v3 }
 0x1f5   :  { %v846_v8 = vpop.xlane.xlu0 %845  ;;  %v1578_v47 = vmax.f32 %v1514_v57, 0.0  ;;  %v1001_v36 = vmul.f32 %v3575_v1, %v3575_v1  ;;  %v1189_v29 = vsub.f32 %v4248_v63, %v3543_v9 }
 0x1f6   :  { %v939_v56 = vmul.f32 0.015625, %v846_v8  ;;  %v1002_v54 = vmul.f32 %v3579_v41, %v3579_v41  ;;  %v4249_v8 = vld [vmem:[#allocation18_spill] sm:$0xff] }
 0x1f7   :  { %v848_v16 = vpop.xlane.xlu1 %847  ;;  %v1629_v2 = vpack.c.bf16 %v1578_v47, %v1577_v40  ;;  %v1190_v40 = vsub.f32 %v4249_v8, %v3547_v44 }
 0x1f8   :  { %v2422_v25 = vpop.eup %2421  ;;  %v1067_v27 = vsub.f32 %v939_v56, %v1003_v45  ;;  %v940_v42 = vmul.f32 0.015625, %v848_v16 }
 0x1f9   :  { %2299 = vmatprep.mubr.bf16.mxu1 %v1629_v2  ;;  %v842_v28 = vpop.xlane.xlu0 %841  ;;  %v1383_v0 = vmul.f32 %v2422_v25, %v1191_v46 }
 0x1fa   :  { %v2424_v7 = vpop.eup %2423  ;;  %v1131_v33 = vmax.f32 %v1067_v27, 0.0  ;;  %v1068_v12 = vsub.f32 %v940_v42, %v1004_v31  ;;  %v937_v22 = vmul.f32 0.015625, %v842_v28  ;;  %2300 = vmatmul.mubr.bf16.gmra.mrb[20].mxu1 %v1630_v38 }
 0x1fb   :  { %v844_v61 = vpop.xlane.xlu1 %843  ;;  %v1384_v52 = vmul.f32 %v2424_v7, %v1192_v17  ;;  %v1451_v56 = vmul.f32 %v3203_v20, %v1383_v0 }
 0x1fc   :  { %v2426_v3 = vpop.eup %2425  ;;  %v1259_v13 = vadd.f32 1e-05, %v1131_v33  ;;  %v1132_v5 = vmax.f32 %v1068_v12, 0.0  ;;  %v1065_v57 = vsub.f32 %v937_v22, %v1001_v36  ;;  %v938_v48 = vmul.f32 0.015625, %v844_v61 }
 0x1fd   :  { %v598_v47 = vpop.xlane.xlu0 %597  ;;  %v1381_v45 = vmul.f32 %v2426_v3, %v1189_v29  ;;  %v1452_v14 = vmul.f32 %v3203_v20, %v1384_v52  ;;  %v1519_v7 = vadd.f32 %v3231_v19, %v1451_v56 }
 0x1fe   :  { %v2428_v9 = vpop.eup %2427  ;;  %2429 = vrsqrt.f32 %v1259_v13  ;;  %v1260_v21 = vadd.f32 1e-05, %v1132_v5  ;;  %v1129_v46 = vmax.f32 %v1065_v57, 0.0  ;;  %v1066_v16 = vsub.f32 %v938_v48, %v1002_v54  ;;  %v4250_v5 = vld [vmem:[#allocation23_spill] sm:$0xff] }
 0x1ff   :  { %v600_v2 = vpop.xlane.xlu1 %599  ;;  %v1382_v25 = vmul.f32 %v2428_v9, %v1190_v40  ;;  %v1449_v31 = vmul.f32 %v3203_v20, %v1381_v45  ;;  %v1520_v44 = vadd.f32 %v3231_v19, %v1452_v14  ;;  %v3599_v0 = vmul.f32 0.015625, %v598_v47 }
 0x200   :  { %2431 = vrsqrt.f32 %v1260_v21  ;;  %v1257_v27 = vadd.f32 1e-05, %v1129_v46  ;;  %v1130_v42 = vmax.f32 %v1066_v16, 0.0  ;;  %v3603_v12 = vmul.f32 0.015625, %v600_v2  ;;  %v4251_v21 = vld [vmem:[#allocation24_spill] sm:$0xff] }
 0x201   :  { %v594_v38 = vpop.xlane.xlu0 %593  ;;  %v1450_v18 = vmul.f32 %v3203_v20, %v1382_v25  ;;  %v1517_v17 = vadd.f32 %v3231_v19, %v1449_v31  ;;  %v1584_v22 = vmax.f32 %v1520_v44, 0.0  ;;  %v1007_v61 = vmul.f32 %v3599_v0, %v3599_v0  ;;  %v4252_v44 = vld [vmem:[#allocation25_spill] sm:$0xff] }
 0x202   :  { %2433 = vrsqrt.f32 %v1257_v27  ;;  %v1258_v28 = vadd.f32 1e-05, %v1130_v42  ;;  %v3607_v52 = vmul.f32 0.015625, %v594_v38  ;;  %v1583_v13 = vmax.f32 %v1519_v7, 0.0 }
 0x203   :  { %v596_v36 = vpop.xlane.xlu1 %595  ;;  %v1518_v33 = vadd.f32 %v3231_v19, %v1450_v18  ;;  %v1581_v29 = vmax.f32 %v1517_v17, 0.0  ;;  %v1195_v57 = vsub.f32 %v4250_v5, %v3567_v10  ;;  %v1008_v45 = vmul.f32 %v3603_v12, %v3603_v12 }
 0x204   :  { %2435 = vrsqrt.f32 %v1258_v28  ;;  %v3611_v48 = vmul.f32 0.015625, %v596_v36  ;;  %v1632_v9 = vpack.c.bf16 %v1584_v22, %v1583_v13  ;;  %v1196_v46 = vsub.f32 %v4251_v21, %v3571_v39 }
 0x205   :  { %v854_v63 = vpop.xlane.xlu0 %853  ;;  %v1582_v54 = vmax.f32 %v1518_v33, 0.0  ;;  %v1005_v10 = vmul.f32 %v3607_v52, %v3607_v52  ;;  %v1193_v38 = vsub.f32 %v4252_v44, %v3575_v1 }
 0x206   :  { %v943_v3 = vmul.f32 0.015625, %v854_v63  ;;  %v1006_v18 = vmul.f32 %v3611_v48, %v3611_v48  ;;  %v4253_v63 = vld [vmem:[#allocation26_spill] sm:$0xff] }
 0x207   :  { %v856_v8 = vpop.xlane.xlu1 %855  ;;  %v1631_v40 = vpack.c.bf16 %v1582_v54, %v1581_v29  ;;  %v1194_v29 = vsub.f32 %v4253_v63, %v3579_v41 }
 0x208   :  { %v2430_v47 = vpop.eup %2429  ;;  %v1071_v56 = vsub.f32 %v943_v3, %v1007_v61  ;;  %v944_v14 = vmul.f32 0.015625, %v856_v8 }
 0x209   :  { %2303 = vmatprep.mubr.bf16.mxu1 %v1631_v40  ;;  %v850_v16 = vpop.xlane.xlu0 %849  ;;  %v1387_v2 = vmul.f32 %v2430_v47, %v1195_v57 }
 0x20a   :  { %v2432_v25 = vpop.eup %2431  ;;  %v1135_v31 = vmax.f32 %v1071_v56, 0.0  ;;  %v1072_v27 = vsub.f32 %v944_v14, %v1008_v45  ;;  %v941_v42 = vmul.f32 0.015625, %v850_v16  ;;  %2304 = vmatmul.mubr.bf16.gmra.mrb[24].mxu1 %v1632_v9 }
 0x20b   :  { %v852_v17 = vpop.xlane.xlu1 %851  ;;  %v1388_v28 = vmul.f32 %v2432_v25, %v1196_v46  ;;  %v1455_v3 = vmul.f32 %v3203_v20, %v1387_v2 }
 0x20c   :  { %v2434_v39 = vpop.eup %2433  ;;  %v1263_v7 = vadd.f32 1e-05, %v1135_v31  ;;  %v1136_v36 = vmax.f32 %v1072_v27, 0.0  ;;  %v1069_v33 = vsub.f32 %v941_v42, %v1005_v10  ;;  %v942_v22 = vmul.f32 0.015625, %v852_v17 }
 0x20d   :  { %v606_v54 = vpop.xlane.xlu0 %605  ;;  %v1385_v61 = vmul.f32 %v2434_v39, %v1193_v38  ;;  %v1456_v13 = vmul.f32 %v3203_v20, %v1388_v28  ;;  %v1523_v25 = vadd.f32 %v3231_v19, %v1455_v3 }
 0x20e   :  { %v2436_v1 = vpop.eup %2435  ;;  %2437 = vrsqrt.f32 %v1263_v7  ;;  %v1264_v5 = vadd.f32 1e-05, %v1136_v36  ;;  %v1133_v57 = vmax.f32 %v1069_v33, 0.0  ;;  %v1070_v8 = vsub.f32 %v942_v22, %v1006_v18  ;;  %v4254_v36 = vld [vmem:[#allocation27_spill] sm:$0xff] }
 0x20f   :  { %v608_v40 = vpop.xlane.xlu1 %607  ;;  %v1386_v47 = vmul.f32 %v2436_v1, %v1194_v29  ;;  %v1453_v45 = vmul.f32 %v3203_v20, %v1385_v61  ;;  %v1524_v41 = vadd.f32 %v3231_v19, %v1456_v13  ;;  %v3631_v2 = vmul.f32 0.015625, %v606_v54 }
 0x210   :  { %2439 = vrsqrt.f32 %v1264_v5  ;;  %v1261_v56 = vadd.f32 1e-05, %v1133_v57  ;;  %v1134_v14 = vmax.f32 %v1070_v8, 0.0  ;;  %v3635_v27 = vmul.f32 0.015625, %v608_v40  ;;  %v4255_v5 = vld [vmem:[#allocation28_spill] sm:$0xff] }
 0x211   :  { %v602_v9 = vpop.xlane.xlu0 %601  ;;  %v1454_v21 = vmul.f32 %v3203_v20, %v1386_v47  ;;  %v1521_v46 = vadd.f32 %v3231_v19, %v1453_v45  ;;  %v1588_v42 = vmax.f32 %v1524_v41, 0.0  ;;  %v1011_v17 = vmul.f32 %v3631_v2, %v3631_v2  ;;  %v4256_v41 = vld [vmem:[#allocation29_spill] sm:$0xff] }
 0x212   :  { %2441 = vrsqrt.f32 %v1261_v56  ;;  %v1262_v16 = vadd.f32 1e-05, %v1134_v14  ;;  %v3639_v28 = vmul.f32 0.015625, %v602_v9  ;;  %v1587_v7 = vmax.f32 %v1523_v25, 0.0 }
 0x213   :  { %v604_v10 = vpop.xlane.xlu1 %603  ;;  %v1522_v31 = vadd.f32 %v3231_v19, %v1454_v21  ;;  %v1585_v38 = vmax.f32 %v1521_v46, 0.0  ;;  %v1199_v33 = vsub.f32 %v4254_v36, %v3599_v0  ;;  %v1012_v61 = vmul.f32 %v3635_v27, %v3635_v27 }
 0x214   :  { %2443 = vrsqrt.f32 %v1262_v16  ;;  %v3643_v22 = vmul.f32 0.015625, %v604_v10  ;;  %v1634_v1 = vpack.c.bf16 %v1588_v42, %v1587_v7  ;;  %v1200_v57 = vsub.f32 %v4255_v5, %v3603_v12 }
 0x215   :  { %v862_v44 = vpop.xlane.xlu0 %861  ;;  %v1586_v18 = vmax.f32 %v1522_v31, 0.0  ;;  %v1009_v0 = vmul.f32 %v3639_v28, %v3639_v28  ;;  %v1197_v9 = vsub.f32 %v4256_v41, %v3607_v52 }
 0x216   :  { %v947_v39 = vmul.f32 0.015625, %v862_v44  ;;  %v1010_v21 = vmul.f32 %v3643_v22, %v3643_v22  ;;  %v4257_v44 = vld [vmem:[#allocation30_spill] sm:$0xff] }
 0x217   :  { %v864_v63 = vpop.xlane.xlu1 %863  ;;  %v1633_v29 = vpack.c.bf16 %v1586_v18, %v1585_v38  ;;  %v1198_v38 = vsub.f32 %v4257_v44, %v3611_v48 }
 0x218   :  { %v2438_v54 = vpop.eup %2437  ;;  %v1075_v3 = vsub.f32 %v947_v39, %v1011_v17  ;;  %v948_v13 = vmul.f32 0.015625, %v864_v63 }
 0x219   :  { %2307 = vmatprep.mubr.bf16.mxu1 %v1633_v29  ;;  %v858_v8 = vpop.xlane.xlu0 %857  ;;  %v1391_v40 = vmul.f32 %v2438_v54, %v1199_v33 }
 0x21a   :  { %v2440_v47 = vpop.eup %2439  ;;  %v1139_v45 = vmax.f32 %v1075_v3, 0.0  ;;  %v1076_v56 = vsub.f32 %v948_v13, %v1012_v61  ;;  %v945_v14 = vmul.f32 0.015625, %v858_v8  ;;  %2308 = vmatmul.mubr.bf16.gmra.mrb[28].mxu1 %v1634_v1 }
 0x21b   :  { %v860_v46 = vpop.xlane.xlu1 %859  ;;  %v1392_v16 = vmul.f32 %v2440_v47, %v1200_v57  ;;  %v1459_v39 = vmul.f32 %v3203_v20, %v1391_v40 }
 0x21c   :  { %v2442_v12 = vpop.eup %2441  ;;  %v1267_v25 = vadd.f32 1e-05, %v1139_v45  ;;  %v1140_v10 = vmax.f32 %v1076_v56, 0.0  ;;  %v1073_v31 = vsub.f32 %v945_v14, %v1009_v0  ;;  %v946_v42 = vmul.f32 0.015625, %v860_v46 }
 0x21d   :  { %v614_v18 = vpop.xlane.xlu0 %613  ;;  %v1389_v17 = vmul.f32 %v2442_v12, %v1197_v9  ;;  %v1460_v7 = vmul.f32 %v3203_v20, %v1392_v16  ;;  %v1527_v47 = vadd.f32 %v3231_v19, %v1459_v39 }
 0x21e   :  { %v2444_v52 = vpop.eup %2443  ;;  %2445 = vrsqrt.f32 %v1267_v25  ;;  %v1268_v36 = vadd.f32 1e-05, %v1140_v10  ;;  %v1137_v33 = vmax.f32 %v1073_v31, 0.0  ;;  %v1074_v63 = vsub.f32 %v946_v42, %v1010_v21 }
 0x21f   :  { %v616_v29 = vpop.xlane.xlu1 %615  ;;  %v1390_v54 = vmul.f32 %v2444_v52, %v1198_v38  ;;  %v1457_v61 = vmul.f32 %v3203_v20, %v1389_v17  ;;  %v1528_v48 = vadd.f32 %v3231_v19, %v1460_v7  ;;  %v3663_v40 = vmul.f32 0.015625, %v614_v18 }
 0x220   :  { %2447 = vrsqrt.f32 %v1268_v36  ;;  %v1265_v3 = vadd.f32 1e-05, %v1137_v33  ;;  %v1138_v13 = vmax.f32 %v1074_v63, 0.0  ;;  %v3667_v56 = vmul.f32 0.015625, %v616_v29 }
 0x221   :  { %v610_v1 = vpop.xlane.xlu0 %609  ;;  %v1458_v5 = vmul.f32 %v3203_v20, %v1390_v54  ;;  %v1525_v57 = vadd.f32 %v3231_v19, %v1457_v61  ;;  %v1592_v14 = vmax.f32 %v1528_v48, 0.0  ;;  %v1015_v46 = vmul.f32 %v3663_v40, %v3663_v40  ;;  %v4258_v61 = vld [vmem:[#allocation31_spill] sm:$0xff] }
 0x222   :  { %2449 = vrsqrt.f32 %v1265_v3  ;;  %v1266_v8 = vadd.f32 1e-05, %v1138_v13  ;;  %v3671_v16 = vmul.f32 0.015625, %v610_v1  ;;  %v1591_v25 = vmax.f32 %v1527_v47, 0.0  ;;  %v4259_v47 = vld [vmem:[#allocation32_spill] sm:$0xff] }
 0x223   :  { %v612_v0 = vpop.xlane.xlu1 %611  ;;  %v1526_v45 = vadd.f32 %v3231_v19, %v1458_v5  ;;  %v1589_v9 = vmax.f32 %v1525_v57, 0.0  ;;  %v1203_v10 = vsub.f32 %v3169_v49, %v3631_v2  ;;  %v1016_v18 = vmul.f32 %v3667_v56, %v3667_v56 }
 0x224   :  { %2451 = vrsqrt.f32 %v1266_v8  ;;  %v3675_v31 = vmul.f32 0.015625, %v612_v0  ;;  %v1636_v7 = vpack.c.bf16 %v1592_v14, %v1591_v25  ;;  %v1204_v52 = vsub.f32 %v3175_v24, %v3635_v27 }
 0x225   :  { %v870_v41 = vpop.xlane.xlu0 %869  ;;  %v1590_v21 = vmax.f32 %v1526_v45, 0.0  ;;  %v1013_v49 = vmul.f32 %v3671_v16, %v3671_v16  ;;  %v1201_v3 = vsub.f32 %v4258_v61, %v3639_v28  ;;  %v1202_v0 = vsub.f32 %v4259_v47, %v3643_v22 }
 0x226   :  { %v951_v12 = vmul.f32 0.015625, %v870_v41  ;;  %v1014_v13 = vmul.f32 %v3675_v31, %v3675_v31 }
 0x227   :  { %v872_v42 = vpop.xlane.xlu1 %871  ;;  %v1635_v44 = vpack.c.bf16 %v1590_v21, %v1589_v9 }
 0x228   :  { %v2446_v38 = vpop.eup %2445  ;;  %v1079_v17 = vsub.f32 %v951_v12, %v1015_v46  ;;  %v952_v39 = vmul.f32 0.015625, %v872_v42 }
 0x229   :  { %2311 = vmatprep.mubr.bf16.mxu1 %v1635_v44  ;;  %v866_v36 = vpop.xlane.xlu0 %865  ;;  %v1395_v33 = vmul.f32 %v2446_v38, %v1203_v10 }
 0x22a   :  { %v2448_v63 = vpop.eup %2447  ;;  %v1143_v2 = vmax.f32 %v1079_v17, 0.0  ;;  %v1080_v29 = vsub.f32 %v952_v39, %v1016_v18  ;;  %v949_v54 = vmul.f32 0.015625, %v866_v36  ;;  %2312 = vmatmul.mubr.bf16.gmra.mrb[32].mxu1 %v1636_v7 }
 0x22b   :  { %v868_v48 = vpop.xlane.xlu1 %867  ;;  %v1396_v1 = vmul.f32 %v2448_v63, %v1204_v52  ;;  %v1463_v41 = vmul.f32 %v3203_v20, %v1395_v33 }
 0x22c   :  { %v2450_v24 = vpop.eup %2449  ;;  %v1271_v27 = vadd.f32 1e-05, %v1143_v2  ;;  %v1144_v5 = vmax.f32 %v1080_v29, 0.0  ;;  %v1077_v57 = vsub.f32 %v949_v54, %v1013_v49  ;;  %v950_v8 = vmul.f32 0.015625, %v868_v48 }
 0x22d   :  { %v622_v45 = vpop.xlane.xlu0 %621  ;;  %v1393_v14 = vmul.f32 %v2450_v24, %v1201_v3  ;;  %v1464_v9 = vmul.f32 %v3203_v20, %v1396_v1  ;;  %v1531_v36 = vadd.f32 %v3231_v19, %v1463_v41  ;;  %v1207_v24 = vsub.f32 %v3226_v4, %v3663_v40 }
 0x22e   :  { %v2452_v28 = vpop.eup %2451  ;;  %2453 = vrsqrt.f32 %v1271_v27  ;;  %v1272_v21 = vadd.f32 1e-05, %v1144_v5  ;;  %v1141_v46 = vmax.f32 %v1077_v57, 0.0  ;;  %v1078_v12 = vsub.f32 %v950_v8, %v1014_v13 }
 0x22f   :  { %v624_v25 = vpop.xlane.xlu1 %623  ;;  %v1394_v10 = vmul.f32 %v2452_v28, %v1202_v0  ;;  %v1461_v42 = vmul.f32 %v3203_v20, %v1393_v14  ;;  %v1532_v22 = vadd.f32 %v3231_v19, %v1464_v9  ;;  %v3695_v52 = vmul.f32 0.015625, %v622_v45 }
 0x230   :  { %2455 = vrsqrt.f32 %v1272_v21  ;;  %v1269_v44 = vadd.f32 1e-05, %v1141_v46  ;;  %v1142_v38 = vmax.f32 %v1078_v12, 0.0  ;;  %v3699_v49 = vmul.f32 0.015625, %v624_v25 }
 0x231   :  { %v618_v18 = vpop.xlane.xlu0 %617  ;;  %v1462_v17 = vmul.f32 %v3203_v20, %v1394_v10  ;;  %v1529_v39 = vadd.f32 %v3231_v19, %v1461_v42  ;;  %v1596_v2 = vmax.f32 %v1532_v22, 0.0  ;;  %v1019_v3 = vmul.f32 %v3695_v52, %v3695_v52 }
 0x232   :  { %2457 = vrsqrt.f32 %v1269_v44  ;;  %v1270_v7 = vadd.f32 1e-05, %v1142_v38  ;;  %v3703_v13 = vmul.f32 0.015625, %v618_v18  ;;  %v1595_v1 = vmax.f32 %v1531_v36, 0.0 }
 0x233   :  { %v620_v33 = vpop.xlane.xlu1 %619  ;;  %v1530_v63 = vadd.f32 %v3231_v19, %v1462_v17  ;;  %v1593_v54 = vmax.f32 %v1529_v39, 0.0  ;;  %v1020_v47 = vmul.f32 %v3699_v49, %v3699_v49  ;;  %v1208_v41 = vsub.f32 %v3237_v35, %v3667_v56 }
 0x234   :  { %2459 = vrsqrt.f32 %v1270_v7  ;;  %v3707_v27 = vmul.f32 0.015625, %v620_v33  ;;  %v1638_v14 = vpack.c.bf16 %v1596_v2, %v1595_v1  ;;  %v1017_v4 = vmul.f32 %v3703_v13, %v3703_v13 }
 0x235   :  { %v878_v29 = vpop.xlane.xlu0 %877  ;;  %v1594_v61 = vmax.f32 %v1530_v63, 0.0  ;;  %v1205_v25 = vsub.f32 %v3244_v23, %v3671_v16  ;;  %v1206_v17 = vsub.f32 %v3255_v26, %v3675_v31 }
 0x236   :  { %v955_v48 = vmul.f32 0.015625, %v878_v29  ;;  %v1018_v10 = vmul.f32 %v3707_v27, %v3707_v27 }
 0x237   :  { %v880_v5 = vpop.xlane.xlu1 %879  ;;  %v1637_v57 = vpack.c.bf16 %v1594_v61, %v1593_v54 }
 0x238   :  { %v2454_v8 = vpop.eup %2453  ;;  %v1083_v0 = vsub.f32 %v955_v48, %v1019_v3  ;;  %v956_v45 = vmul.f32 0.015625, %v880_v5 }
 0x239   :  { %2315 = vmatprep.mubr.bf16.mxu1 %v1637_v57  ;;  %v874_v9 = vpop.xlane.xlu0 %873  ;;  %v1399_v28 = vmul.f32 %v2454_v8, %v1207_v24 }
 0x23a   :  { %v2456_v21 = vpop.eup %2455  ;;  %v1147_v40 = vmax.f32 %v1083_v0, 0.0  ;;  %v1084_v46 = vsub.f32 %v956_v45, %v1020_v47  ;;  %v953_v12 = vmul.f32 0.015625, %v874_v9  ;;  %2316 = vmatmul.mubr.bf16.gmra.mrb[36].mxu1 %v1638_v14 }
 0x23b   :  { %v876_v42 = vpop.xlane.xlu1 %875  ;;  %v1400_v44 = vmul.f32 %v2456_v21, %v1208_v41  ;;  %v1467_v36 = vmul.f32 %v3203_v20, %v1399_v28 }
 0x23c   :  { %v2458_v35 = vpop.eup %2457  ;;  %v1275_v56 = vadd.f32 1e-05, %v1147_v40  ;;  %v1148_v38 = vmax.f32 %v1084_v46, 0.0  ;;  %v1081_v22 = vsub.f32 %v953_v12, %v1017_v4  ;;  %v954_v18 = vmul.f32 0.015625, %v876_v42 }
 0x23d   :  { %v630_v39 = vpop.xlane.xlu0 %629  ;;  %v1397_v7 = vmul.f32 %v2458_v35, %v1205_v25  ;;  %v1468_v33 = vmul.f32 %v3203_v20, %v1400_v44  ;;  %v1535_v8 = vadd.f32 %v3231_v19, %v1467_v36  ;;  %v1211_v12 = vsub.f32 %v3289_v6, %v3695_v52 }
 0x23e   :  { %v2460_v23 = vpop.eup %2459  ;;  %2461 = vrsqrt.f32 %v1275_v56  ;;  %v1276_v16 = vadd.f32 1e-05, %v1148_v38  ;;  %v1145_v63 = vmax.f32 %v1081_v22, 0.0  ;;  %v1082_v2 = vsub.f32 %v954_v18, %v1018_v10 }
 0x23f   :  { %v632_v29 = vpop.xlane.xlu1 %631  ;;  %v1398_v54 = vmul.f32 %v2460_v23, %v1206_v17  ;;  %v1465_v61 = vmul.f32 %v3203_v20, %v1397_v7  ;;  %v1536_v26 = vadd.f32 %v3231_v19, %v1468_v33  ;;  %v3727_v57 = vmul.f32 0.015625, %v630_v39 }
 0x240   :  { %2463 = vrsqrt.f32 %v1276_v16  ;;  %v1273_v3 = vadd.f32 1e-05, %v1145_v63  ;;  %v1146_v48 = vmax.f32 %v1082_v2, 0.0  ;;  %v3731_v45 = vmul.f32 0.015625, %v632_v29 }
 0x241   :  { %v626_v31 = vpop.xlane.xlu0 %625  ;;  %v1466_v1 = vmul.f32 %v3203_v20, %v1398_v54  ;;  %v1533_v24 = vadd.f32 %v3231_v19, %v1465_v61  ;;  %v1600_v14 = vmax.f32 %v1536_v26, 0.0  ;;  %v1023_v21 = vmul.f32 %v3727_v57, %v3727_v57 }
 0x242   :  { %2465 = vrsqrt.f32 %v1273_v3  ;;  %v1274_v5 = vadd.f32 1e-05, %v1146_v48  ;;  %v3735_v4 = vmul.f32 0.015625, %v626_v31  ;;  %v1599_v46 = vmax.f32 %v1535_v8, 0.0 }
 0x243   :  { %v628_v47 = vpop.xlane.xlu1 %627  ;;  %v1534_v0 = vadd.f32 %v3231_v19, %v1466_v1  ;;  %v1597_v9 = vmax.f32 %v1533_v24, 0.0  ;;  %v1024_v35 = vmul.f32 %v3731_v45, %v3731_v45  ;;  %v1212_v18 = vsub.f32 %v3297_v51, %v3699_v49 }
 0x244   :  { %2467 = vrsqrt.f32 %v1274_v5  ;;  %v3739_v25 = vmul.f32 0.015625, %v628_v47  ;;  %v1640_v22 = vpack.c.bf16 %v1600_v14, %v1599_v46  ;;  %v1021_v6 = vmul.f32 %v3735_v4, %v3735_v4 }
 0x245   :  { %v886_v41 = vpop.xlane.xlu0 %885  ;;  %v1598_v28 = vmax.f32 %v1534_v0, 0.0  ;;  %v1209_v23 = vsub.f32 %v3304_v58, %v3703_v13  ;;  %v1210_v3 = vsub.f32 %v3315_v50, %v3707_v27 }
 0x246   :  { %v959_v40 = vmul.f32 0.015625, %v886_v41  ;;  %v1022_v16 = vmul.f32 %v3739_v25, %v3739_v25 }
 0x247   :  { %v888_v10 = vpop.xlane.xlu1 %887  ;;  %v1639_v42 = vpack.c.bf16 %v1598_v28, %v1597_v9 }
 0x248   :  { %v2462_v44 = vpop.eup %2461  ;;  %v1087_v56 = vsub.f32 %v959_v40, %v1023_v21  ;;  %v960_v38 = vmul.f32 0.015625, %v888_v10 }
 0x249   :  { %2319 = vmatprep.mubr.bf16.mxu1 %v1639_v42  ;;  %v882_v17 = vpop.xlane.xlu0 %881  ;;  %v1403_v39 = vmul.f32 %v2462_v44, %v1211_v12 }
 0x24a   :  { %v2464_v7 = vpop.eup %2463  ;;  %v1151_v52 = vmax.f32 %v1087_v56, 0.0  ;;  %v1088_v36 = vsub.f32 %v960_v38, %v1024_v35  ;;  %v957_v33 = vmul.f32 0.015625, %v882_v17  ;;  %2320 = vmatmul.mubr.bf16.gmra.mrb[40].mxu1 %v1640_v22 }
 0x24b   :  { %v884_v63 = vpop.xlane.xlu1 %883  ;;  %v1404_v2 = vmul.f32 %v2464_v7, %v1212_v18  ;;  %v1471_v31 = vmul.f32 %v3203_v20, %v1403_v39  ;;  %v1215_v7 = vsub.f32 %v3349_v62, %v3727_v57 }
 0x24c   :  { %v2466_v51 = vpop.eup %2465  ;;  %v1279_v49 = vadd.f32 1e-05, %v1151_v52  ;;  %v1152_v29 = vmax.f32 %v1088_v36, 0.0  ;;  %v1085_v54 = vsub.f32 %v957_v33, %v1021_v6  ;;  %v958_v61 = vmul.f32 0.015625, %v884_v63 }
 0x24d   :  { %v638_v48 = vpop.xlane.xlu0 %637  ;;  %v1401_v26 = vmul.f32 %v2466_v51, %v1209_v23  ;;  %v1472_v1 = vmul.f32 %v3203_v20, %v1404_v2  ;;  %v1539_v46 = vadd.f32 %v3231_v19, %v1471_v31  ;;  %v1216_v51 = vsub.f32 %v3357_v59, %v3731_v45 }
 0x24e   :  { %v2468_v58 = vpop.eup %2467  ;;  %2469 = vrsqrt.f32 %v1279_v49  ;;  %v1280_v13 = vadd.f32 1e-05, %v1152_v29  ;;  %v1149_v24 = vmax.f32 %v1085_v54, 0.0  ;;  %v1086_v5 = vsub.f32 %v958_v61, %v1022_v16 }
 0x24f   :  { %v640_v8 = vpop.xlane.xlu1 %639  ;;  %v1402_v47 = vmul.f32 %v2468_v58, %v1210_v3  ;;  %v1469_v0 = vmul.f32 %v3203_v20, %v1401_v26  ;;  %v1540_v50 = vadd.f32 %v3231_v19, %v1472_v1  ;;  %v3759_v40 = vmul.f32 0.015625, %v638_v48 }
 0x250   :  { %2471 = vrsqrt.f32 %v1280_v13  ;;  %v1277_v14 = vadd.f32 1e-05, %v1149_v24  ;;  %v1150_v41 = vmax.f32 %v1086_v5, 0.0  ;;  %v3763_v42 = vmul.f32 0.015625, %v640_v8 }
 0x251   :  { %v634_v27 = vpop.xlane.xlu0 %633  ;;  %v1470_v9 = vmul.f32 %v3203_v20, %v1402_v47  ;;  %v1537_v28 = vadd.f32 %v3231_v19, %v1469_v0  ;;  %v1604_v44 = vmax.f32 %v1540_v50, 0.0  ;;  %v1027_v22 = vmul.f32 %v3759_v40, %v3759_v40 }
 0x252   :  { %2473 = vrsqrt.f32 %v1277_v14  ;;  %v1278_v21 = vadd.f32 1e-05, %v1150_v41  ;;  %v3767_v18 = vmul.f32 0.015625, %v634_v27  ;;  %v1603_v39 = vmax.f32 %v1539_v46, 0.0 }
 0x253   :  { %v636_v12 = vpop.xlane.xlu1 %635  ;;  %v1538_v10 = vadd.f32 %v3231_v19, %v1470_v9  ;;  %v1601_v56 = vmax.f32 %v1537_v28, 0.0  ;;  %v1028_v23 = vmul.f32 %v3763_v42, %v3763_v42  ;;  %v1213_v48 = vsub.f32 %v3364_v34, %v3735_v4 }
 0x254   :  { %2475 = vrsqrt.f32 %v1278_v21  ;;  %v3771_v6 = vmul.f32 0.015625, %v636_v12  ;;  %v1642_v2 = vpack.c.bf16 %v1604_v44, %v1603_v39  ;;  %v1025_v62 = vmul.f32 %v3767_v18, %v3767_v18 }
 0x255   :  { %v894_v35 = vpop.xlane.xlu0 %893  ;;  %v1602_v38 = vmax.f32 %v1538_v10, 0.0  ;;  %v1214_v5 = vsub.f32 %v3375_v11, %v3739_v25 }
 0x256   :  { %v963_v17 = vmul.f32 0.015625, %v894_v35  ;;  %v1026_v26 = vmul.f32 %v3771_v6, %v3771_v6 }
 0x257   :  { %v896_v52 = vpop.xlane.xlu1 %895  ;;  %v1641_v36 = vpack.c.bf16 %v1602_v38, %v1601_v56 }
 0x258   :  { %v2470_v33 = vpop.eup %2469  ;;  %v1091_v16 = vsub.f32 %v963_v17, %v1027_v22  ;;  %v964_v63 = vmul.f32 0.015625, %v896_v52 }
 0x259   :  { %2323 = vmatprep.mubr.bf16.mxu1 %v1641_v36  ;;  %v890_v49 = vpop.xlane.xlu0 %889  ;;  %v1407_v29 = vmul.f32 %v2470_v33, %v1215_v7 }
 0x25a   :  { %v2472_v54 = vpop.eup %2471  ;;  %v1155_v57 = vmax.f32 %v1091_v16, 0.0  ;;  %v1092_v61 = vsub.f32 %v964_v63, %v1028_v23  ;;  %v961_v3 = vmul.f32 0.015625, %v890_v49  ;;  %2324 = vmatmul.mubr.bf16.gmra.mrb[44].mxu1 %v1642_v2  ;;  %v1219_v2 = vsub.f32 %v3409_v53, %v3759_v40 }
 0x25b   :  { %v892_v31 = vpop.xlane.xlu1 %891  ;;  %v1408_v1 = vmul.f32 %v2472_v54, %v1216_v51  ;;  %v1475_v0 = vmul.f32 %v3203_v20, %v1407_v29  ;;  %v4260_v54 = vld [vmem:[#allocation2_spill] sm:$0xff] }
 0x25c   :  { %v2474_v59 = vpop.eup %2473  ;;  %v1283_v45 = vadd.f32 1e-05, %v1155_v57  ;;  %v1156_v58 = vmax.f32 %v1092_v61, 0.0  ;;  %v1089_v13 = vsub.f32 %v961_v3, %v1025_v62  ;;  %v962_v24 = vmul.f32 0.015625, %v892_v31 }
 0x25d   :  { %v646_v8 = vpop.xlane.xlu0 %645  ;;  %v1405_v47 = vmul.f32 %v2474_v59, %v1213_v48  ;;  %v1476_v14 = vmul.f32 %v3203_v20, %v1408_v1  ;;  %v1543_v35 = vadd.f32 %v3231_v19, %v1475_v0  ;;  %v1667_v62 = vsub.s32 3, %v4260_v54 }
 0x25e   :  { %v2476_v34 = vpop.eup %2475  ;;  %2477 = vrsqrt.f32 %v1283_v45  ;;  %v1284_v4 = vadd.f32 1e-05, %v1156_v58  ;;  %v1153_v41 = vmax.f32 %v1089_v13, 0.0  ;;  %v1090_v50 = vsub.f32 %v962_v24, %v1026_v26 }
 0x25f   :  { %v648_v27 = vpop.xlane.xlu1 %647  ;;  %v1406_v9 = vmul.f32 %v2476_v34, %v1214_v5  ;;  %v1473_v28 = vmul.f32 %v3203_v20, %v1405_v47  ;;  %v1544_v11 = vadd.f32 %v3231_v19, %v1476_v14  ;;  %v3797_v33 = vmul.f32 0.015625, %v646_v8 }
 0x260   :  { %2479 = vrsqrt.f32 %v1284_v4  ;;  %v1281_v21 = vadd.f32 1e-05, %v1153_v41  ;;  %v1154_v46 = vmax.f32 %v1090_v50, 0.0  ;;  %v1607_v63 = vmax.f32 %v1543_v35, 0.0 }
 0x261   :  { %v642_v25 = vpop.xlane.xlu0 %641  ;;  %v1474_v12 = vmul.f32 %v3203_v20, %v1406_v9  ;;  %v1541_v10 = vadd.f32 %v3231_v19, %v1473_v28  ;;  %v1608_v39 = vmax.f32 %v1544_v11, 0.0  ;;  %v3803_v51 = vmul.f32 0.015625, %v648_v27 }
 0x262   :  { %2481 = vrsqrt.f32 %v1281_v21  ;;  %v1282_v44 = vadd.f32 1e-05, %v1154_v46  ;;  %v3792_v56 = vmul.f32 0.015625, %v642_v25  ;;  %v1220_v31 = vsub.f32 %v3417_v30, %v3763_v42  ;;  %v2493_v30 = vld [vmem:[%s4169_s2] sm:$0xff] }
 0x263   :  { %v644_v38 = vpop.xlane.xlu1 %643  ;;  %v1542_v22 = vadd.f32 %v3231_v19, %v1474_v12  ;;  %v1605_v52 = vmax.f32 %v1541_v10, 0.0  ;;  %v1644_v26 = vpack.c.bf16 %v1608_v39, %v1607_v63  ;;  %v1031_v59 = vmul.f32 %v3797_v33, %v3797_v33 }
 0x264   :  { %2483 = vrsqrt.f32 %v1282_v44  ;;  %v3795_v17 = vmul.f32 0.015625, %v644_v38  ;;  %v1029_v23 = vmul.f32 %v3792_v56, %v3792_v56  ;;  %v1217_v24 = vsub.f32 %v3424_v55, %v3767_v18 }
 0x265   :  { %v898_v7 = vpop.xlane.xlu0 %897  ;;  %v1606_v36 = vmax.f32 %v1542_v22, 0.0  ;;  %v1032_v5 = vmul.f32 %v3803_v51, %v3803_v51  ;;  %v3819_v42 = vrot.slane %v2493_v30, %v1667_v62  ;;  %v1218_v50 = vsub.f32 %v3435_v32, %v3771_v6 }
 0x266   :  { %v965_v16 = vmul.f32 0.015625, %v898_v7  ;;  %v1030_v61 = vmul.f32 %v3795_v17, %v3795_v17 }
 0x267   :  { %v900_v49 = vpop.xlane.xlu1 %899  ;;  %v1643_v29 = vpack.c.bf16 %v1606_v36, %v1605_v52 }
 0x268   :  { %v2478_v57 = vpop.eup %2477  ;;  %v1093_v3 = vsub.f32 %v965_v16, %v1029_v23  ;;  %v966_v48 = vmul.f32 0.015625, %v900_v49 }
 0x269   :  { %2327 = vmatprep.mubr.bf16.mxu1 %v1643_v29  ;;  %v902_v1 = vpop.xlane.xlu0 %901  ;;  %v1411_v53 = vmul.f32 %v2478_v57, %v1219_v2  ;;  %v1221_v57 = vsub.f32 %v3484_v15, %v3792_v56  ;;  %v1224_v15 = vsub.f32 %v3477_v60, %v3803_v51 }
 0x26a   :  { %v2480_v40 = vpop.eup %2479  ;;  %v1157_v45 = vmax.f32 %v1093_v3, 0.0  ;;  %v1094_v58 = vsub.f32 %v966_v48, %v1030_v61  ;;  %v967_v13 = vmul.f32 0.015625, %v902_v1  ;;  %2328 = vmatmul.mubr.bf16.gmra.mrb[48].mxu1 %v1644_v26  ;;  %v1222_v26 = vsub.f32 %v3494_v43, %v3795_v17 }
 0x26b   :  { %v904_v8 = vpop.xlane.xlu1 %903  ;;  %v1412_v47 = vmul.f32 %v2480_v40, %v1220_v31  ;;  %v1479_v27 = vmul.f32 %v3203_v20, %v1411_v53  ;;  %v1223_v53 = vsub.f32 %v3469_v37, %v3797_v33 }
 0x26c   :  { %v2482_v0 = vpop.eup %2481  ;;  %v1285_v14 = vadd.f32 1e-05, %v1157_v45  ;;  %v1158_v34 = vmax.f32 %v1094_v58, 0.0  ;;  %v1095_v4 = vsub.f32 %v967_v13, %v1031_v59  ;;  %v968_v41 = vmul.f32 0.015625, %v904_v8 }
 0x26d   :  { %v2277_v55 = vpop.f32.mrb[64].mxu0  ;;  %v1409_v18 = vmul.f32 %v2482_v0, %v1217_v24  ;;  %v1480_v9 = vmul.f32 %v3203_v20, %v1412_v47  ;;  %v1547_v63 = vadd.f32 %v3231_v19, %v1479_v27 }
 0x26e   :  { %v2484_v28 = vpop.eup %2483  ;;  %2485 = vrsqrt.f32 %v1285_v14  ;;  %v1286_v21 = vadd.f32 1e-05, %v1158_v34  ;;  %v1159_v46 = vmax.f32 %v1095_v4, 0.0  ;;  %v1096_v11 = vsub.f32 %v968_v41, %v1032_v5  ;;  %v1751_v25 = vpop.f32.mrb[65].mxu0 }
 0x26f   :  { %v1760_v12 = vadd.f32 %v2277_v55, %v3819_v42  ;;  %v1752_v10 = vadd.f32 %v1751_v25, %v3819_v42  ;;  %v2278_v44 = vpop.f32.mrb[66].mxu0  ;;  %v1410_v35 = vmul.f32 %v2484_v28, %v1218_v50  ;;  %v1477_v32 = vmul.f32 %v3203_v20, %v1409_v18 }
 0x270   :  { %2487 = vrsqrt.f32 %v1286_v21  ;;  %v1287_v6 = vadd.f32 1e-05, %v1159_v46  ;;  %v1160_v38 = vmax.f32 %v1096_v11, 0.0  ;;  %v1763_v22 = vadd.f32 %v2278_v44, %v3819_v42  ;;  %v1754_v39 = vpop.f32.mrb[67].mxu0 }
 0x271   :  { %2009 = vst.msk [vmem:[%s4171_s4 + $0x10] sm:$0xff] %vm2006_vm1, %v1760_v12  ;;  %2007 = vst.msk [vmem:[%s4171_s4] sm:$0xff] %vm2006_vm1, %v1752_v10  ;;  %v1755_v7 = vadd.f32 %v1754_v39, %v3819_v42  ;;  %v1478_v52 = vmul.f32 %v3203_v20, %v1410_v35  ;;  %v1545_v36 = vadd.f32 %v3231_v19, %v1477_v32  ;;  %v1611_v62 = vmax.f32 %v1547_v63, 0.0 }
 0x272   :  { %v1548_v23 = vadd.f32 %v3231_v19, %v1480_v9  ;;  %2489 = vrsqrt.f32 %v1287_v6  ;;  %v1288_v16 = vadd.f32 1e-05, %v1160_v38  ;;  %2010 = vst.msk [vmem:[%s4171_s4 + $0x18] sm:$0xff] %vm2006_vm1, %v1763_v22 }
 0x273   :  { %2008 = vst.msk [vmem:[%s4171_s4 + $0x8] sm:$0xff] %vm2006_vm1, %v1755_v7  ;;  %v1546_v2 = vadd.f32 %v3231_v19, %v1478_v52  ;;  %v1609_v29 = vmax.f32 %v1545_v36, 0.0 }
 0x274   :  { %2491 = vrsqrt.f32 %v1288_v16  ;;  %v1612_v49 = vmax.f32 %v1548_v23, 0.0 }
 0x275   :  { %v1610_v54 = vmax.f32 %v1546_v2, 0.0 }
 0x276   :  { %v1646_v48 = vpack.c.bf16 %v1612_v49, %v1611_v62 }
 0x277   :  { %v1645_v61 = vpack.c.bf16 %v1610_v54, %v1609_v29 }
 0x278   :  { %v2486_v3 = vpop.eup %2485 }
 0x279   :  { %2331 = vmatprep.mubr.bf16.mxu1 %v1645_v61  ;;  %v1413_v31 = vmul.f32 %v2486_v3, %v1221_v57 }
 0x27a   :  { %v2488_v1 = vpop.eup %2487  ;;  %2332 = vmatmul.mubr.bf16.gmra.mrb[52].mxu1 %v1646_v48 }
 0x27b   :  { %v1414_v40 = vmul.f32 %v2488_v1, %v1222_v26  ;;  %v1481_v59 = vmul.f32 %v3203_v20, %v1413_v31 }
 0x27c   :  { %v2490_v45 = vpop.eup %2489 }
 0x27d   :  { %v2281_v56 = vpop.f32.mrb[0].mxu1  ;;  %v1482_v58 = vmul.f32 %v3203_v20, %v1414_v40  ;;  %v1549_v13 = vadd.f32 %v3231_v19, %v1481_v59  ;;  %v1415_v43 = vmul.f32 %v2490_v45, %v1223_v53 }
 0x27e   :  { %v2492_v17 = vpop.eup %2491  ;;  %v1776_v24 = vadd.f32 %v2281_v56, %v3819_v42  ;;  %v1767_v5 = vpop.f32.mrb[1].mxu1 }
 0x27f   :  { %v1768_v8 = vadd.f32 %v1767_v5, %v3819_v42  ;;  %v2282_v37 = vpop.f32.mrb[2].mxu1  ;;  %v1550_v33 = vadd.f32 %v3231_v19, %v1482_v58  ;;  %v1416_v30 = vmul.f32 %v2492_v17, %v1224_v15  ;;  %v1483_v47 = vmul.f32 %v3203_v20, %v1415_v43 }
 0x280   :  { %2013 = vst.msk [vmem:[%s4171_s4 + $0x30] sm:$0xff] %vm2006_vm1, %v1776_v24  ;;  %v1779_v60 = vadd.f32 %v2282_v37, %v3819_v42  ;;  %v1770_v51 = vpop.f32.mrb[3].mxu1  ;;  %v1613_v14 = vmax.f32 %v1549_v13, 0.0 }
 0x281   :  { %2011 = vst.msk [vmem:[%s4171_s4 + $0x20] sm:$0xff] %vm2006_vm1, %v1768_v8  ;;  %v1771_v0 = vadd.f32 %v1770_v51, %v3819_v42  ;;  %v1614_v34 = vmax.f32 %v1550_v33, 0.0  ;;  %v1484_v4 = vmul.f32 %v3203_v20, %v1416_v30  ;;  %v1551_v41 = vadd.f32 %v3231_v19, %v1483_v47 }
 0x282   :  { %2014 = vst.msk [vmem:[%s4171_s4 + $0x38] sm:$0xff] %vm2006_vm1, %v1779_v60 }
 0x283   :  { %2012 = vst.msk [vmem:[%s4171_s4 + $0x28] sm:$0xff] %vm2006_vm1, %v1771_v0  ;;  %v1647_v50 = vpack.c.bf16 %v1614_v34, %v1613_v14  ;;  %v1552_v55 = vadd.f32 %v3231_v19, %v1484_v4  ;;  %v1615_v18 = vmax.f32 %v1551_v41, 0.0 }
 0x285   :  { %2335 = vmatprep.mubr.bf16.mxu1 %v1647_v50  ;;  %v1616_v27 = vmax.f32 %v1552_v55, 0.0 }
 0x287   :  { %v1648_v9 = vpack.c.bf16 %v1616_v27, %v1615_v18 }
 0x289   :  { %2336 = vmatmul.mubr.bf16.gmra.mrb[56].mxu1 %v1648_v9 }
 0x28d   :  { %v2285_v20 = vpop.f32.mrb[4].mxu1 }
 0x28e   :  { %v1792_v28 = vadd.f32 %v2285_v20, %v3819_v42  ;;  %v1783_v21 = vpop.f32.mrb[5].mxu1 }
 0x28f   :  { %v1784_v46 = vadd.f32 %v1783_v21, %v3819_v42  ;;  %v2286_v11 = vpop.f32.mrb[6].mxu1 }
 0x290   :  { %2017 = vst.msk [vmem:[%s4171_s4 + $0x50] sm:$0xff] %vm2006_vm1, %v1792_v28  ;;  %v1795_v25 = vadd.f32 %v2286_v11, %v3819_v42  ;;  %v1786_v19 = vpop.f32.mrb[7].mxu1 }
 0x291   :  { %2015 = vst.msk [vmem:[%s4171_s4 + $0x40] sm:$0xff] %vm2006_vm1, %v1784_v46  ;;  %v1787_v12 = vadd.f32 %v1786_v19, %v3819_v42 }
 0x292   :  { %2018 = vst.msk [vmem:[%s4171_s4 + $0x58] sm:$0xff] %vm2006_vm1, %v1795_v25 }
 0x293   :  { %2016 = vst.msk [vmem:[%s4171_s4 + $0x48] sm:$0xff] %vm2006_vm1, %v1787_v12 }
 0x29d   :  { %v2289_v10 = vpop.f32.mrb[8].mxu1 }
 0x29e   :  { %v1808_v44 = vadd.f32 %v2289_v10, %v3819_v42  ;;  %v1799_v35 = vpop.f32.mrb[9].mxu1 }
 0x29f   :  { %v1800_v32 = vadd.f32 %v1799_v35, %v3819_v42  ;;  %v2290_v6 = vpop.f32.mrb[10].mxu1 }
 0x2a0   :  { %2021 = vst.msk [vmem:[%s4171_s4 + $0x70] sm:$0xff] %vm2006_vm1, %v1808_v44  ;;  %v1811_v38 = vadd.f32 %v2290_v6, %v3819_v42  ;;  %v1802_v22 = vpop.f32.mrb[11].mxu1 }
 0x2a1   :  { %2019 = vst.msk [vmem:[%s4171_s4 + $0x60] sm:$0xff] %vm2006_vm1, %v1800_v32  ;;  %v1803_v39 = vadd.f32 %v1802_v22, %v3819_v42 }
 0x2a2   :  { %2022 = vst.msk [vmem:[%s4171_s4 + $0x78] sm:$0xff] %vm2006_vm1, %v1811_v38 }
 0x2a3   :  { %2020 = vst.msk [vmem:[%s4171_s4 + $0x68] sm:$0xff] %vm2006_vm1, %v1803_v39 }
 0x2ad   :  { %v2293_v7 = vpop.f32.mrb[12].mxu1 }
 0x2ae   :  { %v1824_v52 = vadd.f32 %v2293_v7, %v3819_v42  ;;  %v1815_v36 = vpop.f32.mrb[13].mxu1 }
 0x2af   :  { %v1816_v23 = vadd.f32 %v1815_v36, %v3819_v42  ;;  %v2294_v16 = vpop.f32.mrb[14].mxu1 }
 0x2b0   :  { %2025 = vst.msk [vmem:[%s4171_s4 + $0x90] sm:$0xff] %vm2006_vm1, %v1824_v52  ;;  %v1827_v63 = vadd.f32 %v2294_v16, %v3819_v42  ;;  %v1818_v2 = vpop.f32.mrb[15].mxu1 }
 0x2b1   :  { %2023 = vst.msk [vmem:[%s4171_s4 + $0x80] sm:$0xff] %vm2006_vm1, %v1816_v23  ;;  %v1819_v49 = vadd.f32 %v1818_v2, %v3819_v42 }
 0x2b2   :  { %2026 = vst.msk [vmem:[%s4171_s4 + $0x98] sm:$0xff] %vm2006_vm1, %v1827_v63 }
 0x2b3   :  { %2024 = vst.msk [vmem:[%s4171_s4 + $0x88] sm:$0xff] %vm2006_vm1, %v1819_v49 }
 0x2bd   :  { %v2297_v29 = vpop.f32.mrb[16].mxu1 }
 0x2be   :  { %v1840_v54 = vadd.f32 %v2297_v29, %v3819_v42  ;;  %v1831_v62 = vpop.f32.mrb[17].mxu1 }
 0x2bf   :  { %v1832_v57 = vadd.f32 %v1831_v62, %v3819_v42  ;;  %v2298_v61 = vpop.f32.mrb[18].mxu1 }
 0x2c0   :  { %2029 = vst.msk [vmem:[%s4171_s4 + $0xb0] sm:$0xff] %vm2006_vm1, %v1840_v54  ;;  %v1843_v3 = vadd.f32 %v2298_v61, %v3819_v42  ;;  %v1834_v48 = vpop.f32.mrb[19].mxu1 }
 0x2c1   :  { %2027 = vst.msk [vmem:[%s4171_s4 + $0xa0] sm:$0xff] %vm2006_vm1, %v1832_v57  ;;  %v1835_v26 = vadd.f32 %v1834_v48, %v3819_v42 }
 0x2c2   :  { %2030 = vst.msk [vmem:[%s4171_s4 + $0xb8] sm:$0xff] %vm2006_vm1, %v1843_v3 }
 0x2c3   :  { %2028 = vst.msk [vmem:[%s4171_s4 + $0xa8] sm:$0xff] %vm2006_vm1, %v1835_v26 }
 0x2cd   :  { %v2301_v31 = vpop.f32.mrb[20].mxu1 }
 0x2ce   :  { %v1856_v1 = vadd.f32 %v2301_v31, %v3819_v42  ;;  %v1847_v53 = vpop.f32.mrb[21].mxu1 }
 0x2cf   :  { %v1848_v40 = vadd.f32 %v1847_v53, %v3819_v42  ;;  %v2302_v59 = vpop.f32.mrb[22].mxu1 }
 0x2d0   :  { %2033 = vst.msk [vmem:[%s4171_s4 + $0xd0] sm:$0xff] %vm2006_vm1, %v1856_v1  ;;  %v1859_v45 = vadd.f32 %v2302_v59, %v3819_v42  ;;  %v1850_v15 = vpop.f32.mrb[23].mxu1 }
 0x2d1   :  { %2031 = vst.msk [vmem:[%s4171_s4 + $0xc0] sm:$0xff] %vm2006_vm1, %v1848_v40  ;;  %v1851_v56 = vadd.f32 %v1850_v15, %v3819_v42 }
 0x2d2   :  { %2034 = vst.msk [vmem:[%s4171_s4 + $0xd8] sm:$0xff] %vm2006_vm1, %v1859_v45 }
 0x2d3   :  { %2032 = vst.msk [vmem:[%s4171_s4 + $0xc8] sm:$0xff] %vm2006_vm1, %v1851_v56 }
 0x2dd   :  { %v2305_v58 = vpop.f32.mrb[24].mxu1 }
 0x2de   :  { %v1872_v13 = vadd.f32 %v2305_v58, %v3819_v42  ;;  %v1863_v43 = vpop.f32.mrb[25].mxu1 }
 0x2df   :  { %v1864_v17 = vadd.f32 %v1863_v43, %v3819_v42  ;;  %v2306_v24 = vpop.f32.mrb[26].mxu1 }
 0x2e0   :  { %2037 = vst.msk [vmem:[%s4171_s4 + $0xf0] sm:$0xff] %vm2006_vm1, %v1872_v13  ;;  %v1875_v5 = vadd.f32 %v2306_v24, %v3819_v42  ;;  %v1866_v8 = vpop.f32.mrb[27].mxu1 }
 0x2e1   :  { %2035 = vst.msk [vmem:[%s4171_s4 + $0xe0] sm:$0xff] %vm2006_vm1, %v1864_v17  ;;  %v1867_v37 = vadd.f32 %v1866_v8, %v3819_v42 }
 0x2e2   :  { %2038 = vst.msk [vmem:[%s4171_s4 + $0xf8] sm:$0xff] %vm2006_vm1, %v1875_v5 }
 0x2e3   :  { %2036 = vst.msk [vmem:[%s4171_s4 + $0xe8] sm:$0xff] %vm2006_vm1, %v1867_v37 }
 0x2ed   :  { %v2309_v33 = vpop.f32.mrb[28].mxu1 }
 0x2ee   :  { %v1888_v30 = vadd.f32 %v2309_v33, %v3819_v42  ;;  %v1879_v60 = vpop.f32.mrb[29].mxu1 }
 0x2ef   :  { %v1880_v51 = vadd.f32 %v1879_v60, %v3819_v42  ;;  %v2310_v47 = vpop.f32.mrb[30].mxu1 }
 0x2f0   :  { %2041 = vst.msk [vmem:[%s4171_s4 + $0x110] sm:$0xff] %vm2006_vm1, %v1888_v30  ;;  %v1891_v0 = vadd.f32 %v2310_v47, %v3819_v42  ;;  %v1882_v14 = vpop.f32.mrb[31].mxu1 }
 0x2f1   :  { %2039 = vst.msk [vmem:[%s4171_s4 + $0x100] sm:$0xff] %vm2006_vm1, %v1880_v51  ;;  %v1883_v34 = vadd.f32 %v1882_v14, %v3819_v42 }
 0x2f2   :  { %2042 = vst.msk [vmem:[%s4171_s4 + $0x118] sm:$0xff] %vm2006_vm1, %v1891_v0 }
 0x2f3   :  { %2040 = vst.msk [vmem:[%s4171_s4 + $0x108] sm:$0xff] %vm2006_vm1, %v1883_v34 }
 0x2fd   :  { %v2313_v4 = vpop.f32.mrb[32].mxu1 }
 0x2fe   :  { %v1904_v41 = vadd.f32 %v2313_v4, %v3819_v42  ;;  %v1895_v50 = vpop.f32.mrb[33].mxu1 }
 0x2ff   :  { %v1896_v55 = vadd.f32 %v1895_v50, %v3819_v42  ;;  %v2314_v18 = vpop.f32.mrb[34].mxu1 }
 0x300   :  { %2045 = vst.msk [vmem:[%s4171_s4 + $0x130] sm:$0xff] %vm2006_vm1, %v1904_v41  ;;  %v1907_v27 = vadd.f32 %v2314_v18, %v3819_v42  ;;  %v1898_v9 = vpop.f32.mrb[35].mxu1 }
 0x301   :  { %2043 = vst.msk [vmem:[%s4171_s4 + $0x120] sm:$0xff] %vm2006_vm1, %v1896_v55  ;;  %v1899_v20 = vadd.f32 %v1898_v9, %v3819_v42 }
 0x302   :  { %2046 = vst.msk [vmem:[%s4171_s4 + $0x138] sm:$0xff] %vm2006_vm1, %v1907_v27 }
 0x303   :  { %2044 = vst.msk [vmem:[%s4171_s4 + $0x128] sm:$0xff] %vm2006_vm1, %v1899_v20 }
 0x30d   :  { %v2317_v28 = vpop.f32.mrb[36].mxu1 }
 0x30e   :  { %v1920_v21 = vadd.f32 %v2317_v28, %v3819_v42  ;;  %v1911_v46 = vpop.f32.mrb[37].mxu1 }
 0x30f   :  { %v1912_v11 = vadd.f32 %v1911_v46, %v3819_v42  ;;  %v2318_v25 = vpop.f32.mrb[38].mxu1 }
 0x310   :  { %2049 = vst.msk [vmem:[%s4171_s4 + $0x150] sm:$0xff] %vm2006_vm1, %v1920_v21  ;;  %v1923_v19 = vadd.f32 %v2318_v25, %v3819_v42  ;;  %v1914_v12 = vpop.f32.mrb[39].mxu1 }
 0x311   :  { %2047 = vst.msk [vmem:[%s4171_s4 + $0x140] sm:$0xff] %vm2006_vm1, %v1912_v11  ;;  %v1915_v10 = vadd.f32 %v1914_v12, %v3819_v42 }
 0x312   :  { %2050 = vst.msk [vmem:[%s4171_s4 + $0x158] sm:$0xff] %vm2006_vm1, %v1923_v19 }
 0x313   :  { %2048 = vst.msk [vmem:[%s4171_s4 + $0x148] sm:$0xff] %vm2006_vm1, %v1915_v10 }
 0x31d   :  { %v2321_v44 = vpop.f32.mrb[40].mxu1 }
 0x31e   :  { %v1936_v35 = vadd.f32 %v2321_v44, %v3819_v42  ;;  %v1927_v32 = vpop.f32.mrb[41].mxu1 }
 0x31f   :  { %v1928_v6 = vadd.f32 %v1927_v32, %v3819_v42  ;;  %v2322_v38 = vpop.f32.mrb[42].mxu1 }
 0x320   :  { %2053 = vst.msk [vmem:[%s4171_s4 + $0x170] sm:$0xff] %vm2006_vm1, %v1936_v35  ;;  %v1939_v22 = vadd.f32 %v2322_v38, %v3819_v42  ;;  %v1930_v39 = vpop.f32.mrb[43].mxu1 }
 0x321   :  { %2051 = vst.msk [vmem:[%s4171_s4 + $0x160] sm:$0xff] %vm2006_vm1, %v1928_v6  ;;  %v1931_v7 = vadd.f32 %v1930_v39, %v3819_v42 }
 0x322   :  { %2054 = vst.msk [vmem:[%s4171_s4 + $0x178] sm:$0xff] %vm2006_vm1, %v1939_v22 }
 0x323   :  { %2052 = vst.msk [vmem:[%s4171_s4 + $0x168] sm:$0xff] %vm2006_vm1, %v1931_v7 }
 0x32d   :  { %v2325_v52 = vpop.f32.mrb[44].mxu1 }
 0x32e   :  { %v1952_v36 = vadd.f32 %v2325_v52, %v3819_v42  ;;  %v1943_v23 = vpop.f32.mrb[45].mxu1 }
 0x32f   :  { %v1944_v16 = vadd.f32 %v1943_v23, %v3819_v42  ;;  %v2326_v63 = vpop.f32.mrb[46].mxu1 }
 0x330   :  { %2057 = vst.msk [vmem:[%s4171_s4 + $0x190] sm:$0xff] %vm2006_vm1, %v1952_v36  ;;  %v1955_v2 = vadd.f32 %v2326_v63, %v3819_v42  ;;  %v1946_v49 = vpop.f32.mrb[47].mxu1 }
 0x331   :  { %2055 = vst.msk [vmem:[%s4171_s4 + $0x180] sm:$0xff] %vm2006_vm1, %v1944_v16  ;;  %v1947_v29 = vadd.f32 %v1946_v49, %v3819_v42 }
 0x332   :  { %2058 = vst.msk [vmem:[%s4171_s4 + $0x198] sm:$0xff] %vm2006_vm1, %v1955_v2 }
 0x333   :  { %2056 = vst.msk [vmem:[%s4171_s4 + $0x188] sm:$0xff] %vm2006_vm1, %v1947_v29 }
 0x33d   :  { %v2329_v54 = vpop.f32.mrb[48].mxu1 }
 0x33e   :  { %v1968_v62 = vadd.f32 %v2329_v54, %v3819_v42  ;;  %v1959_v57 = vpop.f32.mrb[49].mxu1 }
 0x33f   :  { %v1960_v61 = vadd.f32 %v1959_v57, %v3819_v42  ;;  %v2330_v3 = vpop.f32.mrb[50].mxu1 }
 0x340   :  { %2061 = vst.msk [vmem:[%s4171_s4 + $0x1b0] sm:$0xff] %vm2006_vm1, %v1968_v62  ;;  %v1971_v48 = vadd.f32 %v2330_v3, %v3819_v42  ;;  %v1962_v26 = vpop.f32.mrb[51].mxu1 }
 0x341   :  { %2059 = vst.msk [vmem:[%s4171_s4 + $0x1a0] sm:$0xff] %vm2006_vm1, %v1960_v61  ;;  %v1963_v31 = vadd.f32 %v1962_v26, %v3819_v42 }
 0x342   :  { %2062 = vst.msk [vmem:[%s4171_s4 + $0x1b8] sm:$0xff] %vm2006_vm1, %v1971_v48 }
 0x343   :  { %2060 = vst.msk [vmem:[%s4171_s4 + $0x1a8] sm:$0xff] %vm2006_vm1, %v1963_v31 }
 0x34d   :  { %v2333_v1 = vpop.f32.mrb[52].mxu1 }
 0x34e   :  { %v1984_v53 = vadd.f32 %v2333_v1, %v3819_v42  ;;  %v1975_v40 = vpop.f32.mrb[53].mxu1 }
 0x34f   :  { %v1976_v59 = vadd.f32 %v1975_v40, %v3819_v42  ;;  %v2334_v45 = vpop.f32.mrb[54].mxu1 }
 0x350   :  { %2065 = vst.msk [vmem:[%s4171_s4 + $0x1d0] sm:$0xff] %vm2006_vm1, %v1984_v53  ;;  %v1987_v15 = vadd.f32 %v2334_v45, %v3819_v42  ;;  %v1978_v56 = vpop.f32.mrb[55].mxu1 }
 0x351   :  { %2063 = vst.msk [vmem:[%s4171_s4 + $0x1c0] sm:$0xff] %vm2006_vm1, %v1976_v59  ;;  %v1979_v58 = vadd.f32 %v1978_v56, %v3819_v42 }
 0x352   :  { %2066 = vst.msk [vmem:[%s4171_s4 + $0x1d8] sm:$0xff] %vm2006_vm1, %v1987_v15 }
 0x353   :  { %2064 = vst.msk [vmem:[%s4171_s4 + $0x1c8] sm:$0xff] %vm2006_vm1, %v1979_v58 }
 0x35c   :  { %v2337_v13 = vpop.f32.mrb[56].mxu1 }
 0x35d   :  { %v2000_v43 = vadd.f32 %v2337_v13, %v3819_v42  ;;  %v1991_v17 = vpop.f32.mrb[57].mxu1 }
 0x35e   :  { %v1992_v24 = vadd.f32 %v1991_v17, %v3819_v42  ;;  %v2338_v5 = vpop.f32.mrb[58].mxu1 }
 0x35f   :  { %2069 = vst.msk [vmem:[%s4171_s4 + $0x1f0] sm:$0xff] %vm2006_vm1, %v2000_v43  ;;  %v2003_v8 = vadd.f32 %v2338_v5, %v3819_v42  ;;  %v1994_v37 = vpop.f32.mrb[59].mxu1 }
 0x360   :  { %2067 = vst.msk [vmem:[%s4171_s4 + $0x1e0] sm:$0xff] %vm2006_vm1, %v1992_v24  ;;  %v1995_v33 = vadd.f32 %v1994_v37, %v3819_v42 }
 0x361   :  { %2070 = vst.msk [vmem:[%s4171_s4 + $0x1f8] sm:$0xff] %vm2006_vm1, %v2003_v8 }
 0x362   :  { %2068 = vst.msk [vmem:[%s4171_s4 + $0x1e8] sm:$0xff] %vm2006_vm1, %v1995_v33 }

</bundles_post_ra>
